<compile_context>
chip_gen: v6e
topology: v6e:2x2x1
jax: 0.10.0
libtpu: 0.0.40
codegen_flags: <defaults>
</compile_context>

<pallas_src>
import jax
import jax.numpy as jnp
from jax.experimental import pallas as pl
from jax.experimental.pallas import tpu as pltpu

BN_EPS = 1e-5


def _device_kind():
    try:
        return jax.devices()[0].device_kind.lower()
    except Exception:
        return ""


# ----------------------------------------------------------------------------- kernel


def _make_kernel(bf16_epilogue):
    bf16 = jnp.bfloat16

    def kernel(alpha_ref,            # SMEM (4,)  PReLU scalars for layers 1..4
               x_ref,                # (TB, E)    f32 (cast to bf16 in-kernel)
               w1_ref, b1_ref,       # (E, 512) bf16, (1, 512) f32
               w2_ref, b2_ref,       # (512, 256) bf16 (BN-folded), (1, 256) f32
               w3_ref, b3_ref,       # (256, 128) bf16 (BN-folded), (1, 128) f32
               w4_ref, b4_ref,       # (128, 64)  bf16 (BN-folded), (1, 64)  f32
               w5_ref, b5_ref,       # (1, 64) f32, (1, 1) f32
               o_ref):               # (TB, 1) f32
        # Hoist SMEM scalar reads out of the matmul/epilogue chain.
        a1 = alpha_ref[0]
        a2 = alpha_ref[1]
        a3 = alpha_ref[2]
        a4 = alpha_ref[3]

        # In-kernel f32 -> bf16 cast: VPU work hidden under the MXU matmuls,
        # avoids a separate host-side cast pass over HBM.
        x = x_ref[...].astype(bf16)

        def prelu(h_f32, a, last=False):
            if bf16_epilogue and not last:
                hb = h_f32.astype(bf16)
                return jnp.where(hb >= 0, hb, a.astype(bf16) * hb)   # bf16 (next LHS)
            return jnp.where(h_f32 >= 0, h_f32, a * h_f32)           # f32

        def lhs(h):
            return h if h.dtype == bf16 else h.astype(bf16)

        # Layer 1: Linear(E -> 512) + PReLU
        h = prelu(jnp.dot(x, w1_ref[...], preferred_element_type=jnp.float32)
                  + b1_ref[...], a1)
        # Layer 2: Linear(512 -> 256) with BN folded in + PReLU (+ Dropout(eval)=id)
        h = prelu(jnp.dot(lhs(h), w2_ref[...], preferred_element_type=jnp.float32)
                  + b2_ref[...], a2)
        # Layer 3: Linear(256 -> 128) with BN folded in + PReLU (+ Dropout(eval)=id)
        h = prelu(jnp.dot(lhs(h), w3_ref[...], preferred_element_type=jnp.float32)
                  + b3_ref[...], a3)
        # Layer 4: Linear(128 -> 64) with BN folded in + PReLU (+ Dropout(eval)=id)
        h = prelu(jnp.dot(lhs(h), w4_ref[...], preferred_element_type=jnp.float32)
                  + b4_ref[...], a4, last=True)                       # keep f32

        # Layer 5: Linear(64 -> 1) as VPU multiply + lane reduce (no N=1 MXU pass).
        o_ref[...] = jnp.sum(h * w5_ref[...], axis=-1, keepdims=True) + b5_ref[...]

    return kernel


# ------------------------------------------------------------------- parameter folding


def _fold_params(params):
    """Fold eval-mode BatchNorm1d into the preceding Linear's weight/bias (f32)."""
    def bn_scale_shift(p):
        scale = p["gamma"] / jnp.sqrt(p["var"] + BN_EPS)
        shift = p["beta"] - p["mean"] * scale
        return scale, shift

    s2, t2 = bn_scale_shift(params["bn2"])
    s3, t3 = bn_scale_shift(params["bn3"])
    s4, t4 = bn_scale_shift(params["bn4"])

    return {
        "w1": params["w1"], "b1": params["b1"],
        "w2": params["w2"] * s2[None, :], "b2": params["b2"] * s2 + t2,
        "w3": params["w3"] * s3[None, :], "b3": params["b3"] * s3 + t3,
        "w4": params["w4"] * s4[None, :], "b4": params["b4"] * s4 + t4,
        "w5": params["w5"], "b5": params["b5"],
        "alphas": jnp.stack([params["a1"], params["a2"],
                             params["a3"], params["a4"]]).astype(jnp.float32),
    }


def prepare_params(params):
    """One-time host-side prep (call once, NOT per forward): BN fold + dtype casts."""
    f = _fold_params(params)
    bf16 = jnp.bfloat16
    return {
        "w1": f["w1"].astype(bf16), "b1": f["b1"].reshape(1, -1).astype(jnp.float32),
        "w2": f["w2"].astype(bf16), "b2": f["b2"].reshape(1, -1).astype(jnp.float32),
        "w3": f["w3"].astype(bf16), "b3": f["b3"].reshape(1, -1).astype(jnp.float32),
        "w4": f["w4"].astype(bf16), "b4": f["b4"].reshape(1, -1).astype(jnp.float32),
        "w5": f["w5"].reshape(1, -1).astype(jnp.float32),       # (1, 64) — VPU path
        "b5": f["b5"].reshape(1, 1).astype(jnp.float32),
        "alphas": f["alphas"],
    }


# ------------------------------------------------------------------------------ wrapper


def _pick_block_rows(B, block_rows, kind):
    if block_rows is None:
        if "v5" in kind:
            block_rows = 1024          # MXU-bound at TB=1024; bigger buys nothing
        elif "v6" in kind:
            block_rows = 4096          # 128 MiB VMEM: amortize per-step overhead
        else:
            block_rows = 2048          # v7x / unknown: 64 MiB VMEM, keep headroom
    if B < 16:
        return B
    # >= 2 grid steps so the "parallel" batch axis actually shards across TCs.
    tb = min(block_rows, pl.cdiv(B, 2))
    tb = max(8, (tb // 8) * 8)
    return min(tb, B)


def _vmem_limit_bytes(TB, E, weight_bytes, kind):
    x_bytes = 2 * TB * E * 4                 # double-buffered f32 input tile
    out_bytes = 2 * TB * 4                   # double-buffered f32 output tile
    interm_bytes = TB * (512 + 512) * 4      # live f32 intermediates + headroom
    est = weight_bytes + x_bytes + out_bytes + interm_bytes
    limit = int(est * 1.5) + (4 << 20)
    cap = (100 << 20) if ("v5" in kind or "v6" in kind) else (56 << 20)   # v7x: 64 MiB phys
    return max(16 << 20, min(limit, cap))


def bertweet_base_mlp(x, params, *, block_rows=None, bf16_epilogue=None):
    """x: (B, E) f32.  params: raw dict from init_params OR prepared dict from
    prepare_params.  Returns (B, 1) f32 logits (eval-mode forward)."""
    B, E = x.shape
    if "bn2" in params:                       # raw params -> fold/cast on the fly
        params = prepare_params(params)

    kind = _device_kind()
    if bf16_epilogue is None:
        # bf16 VPU exists on v6e/v7x; on v5e and older a bf16 epilogue would cost more.
        bf16_epilogue = not any(g in kind for g in ("v2", "v3", "v4", "v5"))

    TB = _pick_block_rows(B, block_rows, kind)
    grid = (pl.cdiv(B, TB),)

    weights = (params["w1"], params["b1"], params["w2"], params["b2"],
               params["w3"], params["b3"], params["w4"], params["b4"],
               params["w5"], params["b5"])
    weight_bytes = sum(int(a.size) * a.dtype.itemsize for a in weights)
    vmem_limit = _vmem_limit_bytes(TB, E, weight_bytes, kind)

    const = lambda i, alphas: (0, 0)          # weights/biases stay VMEM-resident

    def build_in_specs(single_buffer_weights):
        if single_buffer_weights:
            wspec = lambda a: pl.BlockSpec(a.shape, const,
                                           pipeline_mode=pl.Buffered(1))
        else:
            wspec = lambda a: pl.BlockSpec(a.shape, const)
        return ([pl.BlockSpec((TB, E), lambda i, alphas: (i, 0))]   # x: batch-tiled
                + [wspec(a) for a in weights])

    out_specs = pl.BlockSpec((TB, 1), lambda i, alphas: (i, 0))

    flops = 2 * B * (E * 512 + 512 * 256 + 256 * 128 + 128 * 64 + 64)
    bytes_accessed = int(x.size) * 4 + weight_bytes + B * 4

    def run(single_buffer_weights):
        return pl.pallas_call(
            _make_kernel(bf16_epilogue),
            out_shape=jax.ShapeDtypeStruct((B, 1), jnp.float32),
            grid_spec=pltpu.PrefetchScalarGridSpec(
                num_scalar_prefetch=1,                 # alphas -> SMEM
                grid=grid,
                in_specs=build_in_specs(single_buffer_weights),
                out_specs=out_specs,
            ),
            compiler_params=pltpu.CompilerParams(
                dimension_semantics=("parallel",),     # shard batch loop across TCs
                vmem_limit_bytes=vmem_limit,
            ),
            cost_estimate=pl.CostEstimate(
                flops=flops, transcendentals=0, bytes_accessed=bytes_accessed),
        )(params["alphas"], x.astype(jnp.float32), *weights)

    try:
        return run(True)     # single-buffered resident weights (frees VMEM for larger TB)
    except Exception:
        return run(False)    # fall back to default double-buffering


# ----------------------------------------------------------------------- init / reference


def init_params(key, embedding_dim):
    """Deterministic init mimicking PyTorch defaults (U(-1/sqrt(fan_in), +1/sqrt(fan_in)))."""
    dims = [embedding_dim, 512, 256, 128, 64, 1]
    params = {}
    keys = jax.random.split(key, 16)
    ki = 0
    for li in range(5):
        fan_in, fan_out = dims[li], dims[li + 1]
        bound = 1.0 / jnp.sqrt(fan_in)
        params[f"w{li + 1}"] = jax.random.uniform(
            keys[ki], (fan_in, fan_out), jnp.float32, -bound, bound); ki += 1
        params[f"b{li + 1}"] = jax.random.uniform(
            keys[ki], (fan_out,), jnp.float32, -bound, bound); ki += 1
    for li in range(1, 5):                          # PReLU default init 0.25
        params[f"a{li}"] = jnp.float32(0.25)
    for name, n in (("bn2", 256), ("bn3", 128), ("bn4", 64)):   # BN defaults
        params[name] = {
            "gamma": jnp.ones((n,), jnp.float32),
            "beta": jnp.zeros((n,), jnp.float32),
            "mean": jnp.zeros((n,), jnp.float32),
            "var": jnp.ones((n,), jnp.float32),
        }
    return params


def _reference_f32(x, params):
    """Pure-JAX f32 reference of the eval-mode forward pass (PyTorch semantics)."""
    def prelu(h, a):
        return jnp.where(h >= 0, h, a * h)

    def bn(h, p):
        scale = p["gamma"] / jnp.sqrt(p["var"] + BN_EPS)
        return (h - p["mean"]) * scale + p["beta"]

    h = prelu(x @ params["w1"] + params["b1"], params["a1"])
    h = prelu(bn(h @ params["w2"] + params["b2"], params["bn2"]), params["a2"])
    h = prelu(bn(h @ params["w3"] + params["b3"], params["bn3"]), params["a3"])
    h = prelu(bn(h @ params["w4"] + params["b4"], params["bn4"]), params["a4"])
    return h @ params["w5"] + params["b5"]


def _reference_kernel_numerics(x, params, bf16_epilogue):
    """Mirror of the kernel numerics: BN folded, bf16 matmul operands, f32 accumulation,
    optional bf16 PReLU epilogue on layers 1-3."""
    f = _fold_params(params)
    bf16 = jnp.bfloat16

    def prelu(h, a, last=False):
        if bf16_epilogue and not last:
            hb = h.astype(bf16)
            return jnp.where(hb >= 0, hb, a.astype(bf16) * hb)
        return jnp.where(h >= 0, h, a * h)

    def mm(h, w):
        lhs = h if h.dtype == bf16 else h.astype(bf16)
        return jnp.dot(lhs, w.astype(bf16), preferred_element_type=jnp.float32)

    h = prelu(mm(x, f["w1"]) + f["b1"], params["a1"])
    h = prelu(mm(h, f["w2"]) + f["b2"], params["a2"])
    h = prelu(mm(h, f["w3"]) + f["b3"], params["a3"])
    h = prelu(mm(h, f["w4"]) + f["b4"], params["a4"], last=True)
    return h @ f["w5"].astype(jnp.float32) + f["b5"]


if __name__ == "__main__":
    B, E = 8, 32
    key = jax.random.PRNGKey(0)
    kx, kp, kbn = jax.random.split(key, 3)
    x = jax.random.normal(kx, (B, E), jnp.float32)
    params = init_params(kp, E)

    # Stress the BN-fold path with non-trivial running stats (correctness concern).
    bn_keys = jax.random.split(kbn, 12)
    ki = 0
    for name, n in (("bn2", 256), ("bn3", 128), ("bn4", 64)):
        params[name] = {
            "gamma": jax.random.uniform(bn_keys[ki], (n,), jnp.float32, 0.5, 1.5),
            "beta": 0.1 * jax.random.normal(bn_keys[ki + 1], (n,), jnp.float32),
            "mean": 0.1 * jax.random.normal(bn_keys[ki + 2], (n,), jnp.float32),
            "var": jax.random.uniform(bn_keys[ki + 3], (n,), jnp.float32, 0.5, 2.0),
        }
        ki += 4

    kind = _device_kind()
    bf16_epi = not any(g in kind for g in ("v2", "v3", "v4", "v5"))

    prepared = prepare_params(params)            # one-time fold + dtype cast (hoisted)
    out = bertweet_base_mlp(x, prepared, bf16_epilogue=bf16_epi)
    out = jax.block_until_ready(out)

    ref_exact = _reference_kernel_numerics(x, params, bf16_epi)  # kernel numerics mirror
    ref_f32 = _reference_f32(x, params)                          # full-precision sanity

    assert out.shape == (B, 1)
    assert jnp.allclose(out, ref_exact, atol=2e-2, rtol=2e-2), (out, ref_exact)
    assert jnp.allclose(out, ref_f32, atol=8e-2, rtol=8e-2), (out, ref_f32)
    print("KERNEL_OK")
</pallas_src>

<mosaic_0001>
module attributes {stable_mosaic.version = 11 : i64} {
  func.func @kernel(%arg0: i32, %arg1: memref<4xf32, #tpu.memory_space<smem>>, %arg2: memref<8x32xf32, #tpu.memory_space<vmem>>, %arg3: memref<32x512xbf16, #tpu.memory_space<vmem>>, %arg4: memref<1x512xf32, #tpu.memory_space<vmem>>, %arg5: memref<512x256xbf16, #tpu.memory_space<vmem>>, %arg6: memref<1x256xf32, #tpu.memory_space<vmem>>, %arg7: memref<256x128xbf16, #tpu.memory_space<vmem>>, %arg8: memref<1x128xf32, #tpu.memory_space<vmem>>, %arg9: memref<128x64xbf16, #tpu.memory_space<vmem>>, %arg10: memref<1x64xf32, #tpu.memory_space<vmem>>, %arg11: memref<1x64xf32, #tpu.memory_space<vmem>>, %arg12: memref<1x1xf32, #tpu.memory_space<vmem>>, %arg13: memref<8x1xf32, #tpu.memory_space<vmem>>) attributes {dimension_semantics = [#tpu.dimension_semantics<parallel>], iteration_bounds = array<i64: 1>, scalar_prefetch = 1 : i64, scratch_operands = 0 : i64, tpu.core_type = #tpu.core_type<tc>, window_params = [{transform_indices = @transform_0, window_bounds = array<i64: 8, 32>}, {pipeline_mode = #tpu.pipeline_mode<synchronous>, transform_indices = @transform_1, window_bounds = array<i64: 32, 512>}, {pipeline_mode = #tpu.pipeline_mode<synchronous>, transform_indices = @transform_2, window_bounds = array<i64: 1, 512>}, {pipeline_mode = #tpu.pipeline_mode<synchronous>, transform_indices = @transform_3, window_bounds = array<i64: 512, 256>}, {pipeline_mode = #tpu.pipeline_mode<synchronous>, transform_indices = @transform_4, window_bounds = array<i64: 1, 256>}, {pipeline_mode = #tpu.pipeline_mode<synchronous>, transform_indices = @transform_5, window_bounds = array<i64: 256, 128>}, {pipeline_mode = #tpu.pipeline_mode<synchronous>, transform_indices = @transform_6, window_bounds = array<i64: 1, 128>}, {pipeline_mode = #tpu.pipeline_mode<synchronous>, transform_indices = @transform_7, window_bounds = array<i64: 128, 64>}, {pipeline_mode = #tpu.pipeline_mode<synchronous>, transform_indices = @transform_8, window_bounds = array<i64: 1, 64>}, {pipeline_mode = #tpu.pipeline_mode<synchronous>, transform_indices = @transform_9, window_bounds = array<i64: 1, 64>}, {pipeline_mode = #tpu.pipeline_mode<synchronous>, transform_indices = @transform_10, window_bounds = array<i64: 1, 1>}, {transform_indices = @transform_11, window_bounds = array<i64: 8, 1>}]} {
    %c0 = arith.constant 0 : index
    %0 = memref.load %arg1[%c0] : memref<4xf32, #tpu.memory_space<smem>>
    %c1 = arith.constant 1 : index
    %1 = memref.load %arg1[%c1] : memref<4xf32, #tpu.memory_space<smem>>
    %c2 = arith.constant 2 : index
    %2 = memref.load %arg1[%c2] : memref<4xf32, #tpu.memory_space<smem>>
    %c3 = arith.constant 3 : index
    %3 = memref.load %arg1[%c3] : memref<4xf32, #tpu.memory_space<smem>>
    %c0_0 = arith.constant 0 : index
    %c0_1 = arith.constant 0 : index
    %4 = vector.load %arg2[%c0_0, %c0_1] : memref<8x32xf32, #tpu.memory_space<vmem>>, vector<8x32xf32>
    %5 = arith.truncf %4 : vector<8x32xf32> to vector<8x32xbf16>
    %c0_2 = arith.constant 0 : index
    %c0_3 = arith.constant 0 : index
    %6 = vector.load %arg3[%c0_2, %c0_3] : memref<32x512xbf16, #tpu.memory_space<vmem>>, vector<32x512xbf16>
    %cst = arith.constant dense<0.000000e+00> : vector<8x512xf32>
    %7 = tpu.matmul %5, %6, %cst {dimension_numbers = #tpu.dot_dimension_numbers<[1], [0], [0], [1], [0, 0, 1, 1], [], []>} : vector<8x32xbf16>, vector<32x512xbf16>, vector<8x512xf32> -> vector<8x512xf32>
    %c0_4 = arith.constant 0 : index
    %c0_5 = arith.constant 0 : index
    %8 = vector.load %arg4[%c0_4, %c0_5] : memref<1x512xf32, #tpu.memory_space<vmem>>, vector<1x512xf32>
    %9 = vector.broadcast %8 : vector<1x512xf32> to vector<8x512xf32>
    %10 = arith.addf %7, %9 : vector<8x512xf32>
    %11 = arith.truncf %10 : vector<8x512xf32> to vector<8x512xbf16>
    %cst_6 = arith.constant 0.000000e+00 : bf16
    %12 = vector.broadcast %cst_6 : bf16 to vector<8x512xbf16>
    %13 = arith.cmpf oge, %11, %12 : vector<8x512xbf16>
    %14 = arith.truncf %0 : f32 to bf16
    %15 = vector.broadcast %14 : bf16 to vector<8x512xbf16>
    %16 = arith.mulf %15, %11 : vector<8x512xbf16>
    %17 = arith.select %13, %11, %16 : vector<8x512xi1>, vector<8x512xbf16>
    %c0_7 = arith.constant 0 : index
    %c0_8 = arith.constant 0 : index
    %18 = vector.load %arg5[%c0_7, %c0_8] : memref<512x256xbf16, #tpu.memory_space<vmem>>, vector<512x256xbf16>
    %cst_9 = arith.constant dense<0.000000e+00> : vector<8x256xf32>
    %19 = tpu.matmul %17, %18, %cst_9 {dimension_numbers = #tpu.dot_dimension_numbers<[1], [0], [0], [1], [0, 0, 1, 1], [], []>} : vector<8x512xbf16>, vector<512x256xbf16>, vector<8x256xf32> -> vector<8x256xf32>
    %c0_10 = arith.constant 0 : index
    %c0_11 = arith.constant 0 : index
    %20 = vector.load %arg6[%c0_10, %c0_11] : memref<1x256xf32, #tpu.memory_space<vmem>>, vector<1x256xf32>
    %21 = vector.broadcast %20 : vector<1x256xf32> to vector<8x256xf32>
    %22 = arith.addf %19, %21 : vector<8x256xf32>
    %23 = arith.truncf %22 : vector<8x256xf32> to vector<8x256xbf16>
    %cst_12 = arith.constant 0.000000e+00 : bf16
    %24 = vector.broadcast %cst_12 : bf16 to vector<8x256xbf16>
    %25 = arith.cmpf oge, %23, %24 : vector<8x256xbf16>
    %26 = arith.truncf %1 : f32 to bf16
    %27 = vector.broadcast %26 : bf16 to vector<8x256xbf16>
    %28 = arith.mulf %27, %23 : vector<8x256xbf16>
    %29 = arith.select %25, %23, %28 : vector<8x256xi1>, vector<8x256xbf16>
    %c0_13 = arith.constant 0 : index
    %c0_14 = arith.constant 0 : index
    %30 = vector.load %arg7[%c0_13, %c0_14] : memref<256x128xbf16, #tpu.memory_space<vmem>>, vector<256x128xbf16>
    %cst_15 = arith.constant dense<0.000000e+00> : vector<8x128xf32>
    %31 = tpu.matmul %29, %30, %cst_15 {dimension_numbers = #tpu.dot_dimension_numbers<[1], [0], [0], [1], [0, 0, 1, 1], [], []>} : vector<8x256xbf16>, vector<256x128xbf16>, vector<8x128xf32> -> vector<8x128xf32>
    %c0_16 = arith.constant 0 : index
    %c0_17 = arith.constant 0 : index
    %32 = vector.load %arg8[%c0_16, %c0_17] : memref<1x128xf32, #tpu.memory_space<vmem>>, vector<1x128xf32>
    %33 = vector.broadcast %32 : vector<1x128xf32> to vector<8x128xf32>
    %34 = arith.addf %31, %33 : vector<8x128xf32>
    %35 = arith.truncf %34 : vector<8x128xf32> to vector<8x128xbf16>
    %cst_18 = arith.constant 0.000000e+00 : bf16
    %36 = vector.broadcast %cst_18 : bf16 to vector<8x128xbf16>
    %37 = arith.cmpf oge, %35, %36 : vector<8x128xbf16>
    %38 = arith.truncf %2 : f32 to bf16
    %39 = vector.broadcast %38 : bf16 to vector<8x128xbf16>
    %40 = arith.mulf %39, %35 : vector<8x128xbf16>
    %41 = arith.select %37, %35, %40 : vector<8x128xi1>, vector<8x128xbf16>
    %c0_19 = arith.constant 0 : index
    %c0_20 = arith.constant 0 : index
    %42 = vector.load %arg9[%c0_19, %c0_20] : memref<128x64xbf16, #tpu.memory_space<vmem>>, vector<128x64xbf16>
    %cst_21 = arith.constant dense<0.000000e+00> : vector<8x64xf32>
    %43 = tpu.matmul %41, %42, %cst_21 {dimension_numbers = #tpu.dot_dimension_numbers<[1], [0], [0], [1], [0, 0, 1, 1], [], []>} : vector<8x128xbf16>, vector<128x64xbf16>, vector<8x64xf32> -> vector<8x64xf32>
    %c0_22 = arith.constant 0 : index
    %c0_23 = arith.constant 0 : index
    %44 = vector.load %arg10[%c0_22, %c0_23] : memref<1x64xf32, #tpu.memory_space<vmem>>, vector<1x64xf32>
    %45 = vector.broadcast %44 : vector<1x64xf32> to vector<8x64xf32>
    %46 = arith.addf %43, %45 : vector<8x64xf32>
    %cst_24 = arith.constant 0.000000e+00 : f32
    %47 = vector.broadcast %cst_24 : f32 to vector<8x64xf32>
    %48 = arith.cmpf oge, %46, %47 : vector<8x64xf32>
    %49 = vector.broadcast %3 : f32 to vector<8x64xf32>
    %50 = arith.mulf %49, %46 : vector<8x64xf32>
    %51 = arith.select %48, %46, %50 : vector<8x64xi1>, vector<8x64xf32>
    %c0_25 = arith.constant 0 : index
    %c0_26 = arith.constant 0 : index
    %52 = vector.load %arg11[%c0_25, %c0_26] : memref<1x64xf32, #tpu.memory_space<vmem>>, vector<1x64xf32>
    %53 = vector.broadcast %52 : vector<1x64xf32> to vector<8x64xf32>
    %54 = arith.mulf %51, %53 : vector<8x64xf32>
    %cst_27 = arith.constant dense<0.000000e+00> : vector<8xf32>
    %55 = vector.multi_reduction <add>, %54, %cst_27 [1] : vector<8x64xf32> to vector<8xf32>
    %56 = vector.shape_cast %55 : vector<8xf32> to vector<8x1xf32>
    %c0_28 = arith.constant 0 : index
    %c0_29 = arith.constant 0 : index
    %57 = vector.load %arg12[%c0_28, %c0_29] : memref<1x1xf32, #tpu.memory_space<vmem>>, vector<1x1xf32>
    %58 = vector.broadcast %57 : vector<1x1xf32> to vector<8x1xf32>
    %59 = arith.addf %56, %58 : vector<8x1xf32>
    %c0_30 = arith.constant 0 : index
    %c0_31 = arith.constant 0 : index
    %60 = vector.load %arg13[%c0_30, %c0_31] : memref<8x1xf32, #tpu.memory_space<vmem>>, vector<8x1xf32>
    tpu.vector_store %arg13[%c0_30, %c0_31], %59 {strides = array<i32>} : memref<8x1xf32, #tpu.memory_space<vmem>>, vector<8x1xf32>,
    return
  }
  func.func @transform_0(%arg0: i32, %arg1: memref<4xf32, #tpu.memory_space<smem>>) -> (i32, i32) {
    %c0_i32 = arith.constant 0 : i32
    %c0_i32_0 = arith.constant 0 : i32
    return %arg0, %c0_i32 : i32, i32
  }
  func.func @transform_1(%arg0: i32, %arg1: memref<4xf32, #tpu.memory_space<smem>>) -> (i32, i32) {
    %c0_i32 = arith.constant 0 : i32
    %c0_i32_0 = arith.constant 0 : i32
    %c0_i32_1 = arith.constant 0 : i32
    return %c0_i32, %c0_i32_0 : i32, i32
  }
  func.func @transform_2(%arg0: i32, %arg1: memref<4xf32, #tpu.memory_space<smem>>) -> (i32, i32) {
    %c0_i32 = arith.constant 0 : i32
    %c0_i32_0 = arith.constant 0 : i32
    %c0_i32_1 = arith.constant 0 : i32
    return %c0_i32, %c0_i32_0 : i32, i32
  }
  func.func @transform_3(%arg0: i32, %arg1: memref<4xf32, #tpu.memory_space<smem>>) -> (i32, i32) {
    %c0_i32 = arith.constant 0 : i32
    %c0_i32_0 = arith.constant 0 : i32
    %c0_i32_1 = arith.constant 0 : i32
    return %c0_i32, %c0_i32_0 : i32, i32
  }
  func.func @transform_4(%arg0: i32, %arg1: memref<4xf32, #tpu.memory_space<smem>>) -> (i32, i32) {
    %c0_i32 = arith.constant 0 : i32
    %c0_i32_0 = arith.constant 0 : i32
    %c0_i32_1 = arith.constant 0 : i32
    return %c0_i32, %c0_i32_0 : i32, i32
  }
  func.func @transform_5(%arg0: i32, %arg1: memref<4xf32, #tpu.memory_space<smem>>) -> (i32, i32) {
    %c0_i32 = arith.constant 0 : i32
    %c0_i32_0 = arith.constant 0 : i32
    %c0_i32_1 = arith.constant 0 : i32
    return %c0_i32, %c0_i32_0 : i32, i32
  }
  func.func @transform_6(%arg0: i32, %arg1: memref<4xf32, #tpu.memory_space<smem>>) -> (i32, i32) {
    %c0_i32 = arith.constant 0 : i32
    %c0_i32_0 = arith.constant 0 : i32
    %c0_i32_1 = arith.constant 0 : i32
    return %c0_i32, %c0_i32_0 : i32, i32
  }
  func.func @transform_7(%arg0: i32, %arg1: memref<4xf32, #tpu.memory_space<smem>>) -> (i32, i32) {
    %c0_i32 = arith.constant 0 : i32
    %c0_i32_0 = arith.constant 0 : i32
    %c0_i32_1 = arith.constant 0 : i32
    return %c0_i32, %c0_i32_0 : i32, i32
  }
  func.func @transform_8(%arg0: i32, %arg1: memref<4xf32, #tpu.memory_space<smem>>) -> (i32, i32) {
    %c0_i32 = arith.constant 0 : i32
    %c0_i32_0 = arith.constant 0 : i32
    %c0_i32_1 = arith.constant 0 : i32
    return %c0_i32, %c0_i32_0 : i32, i32
  }
  func.func @transform_9(%arg0: i32, %arg1: memref<4xf32, #tpu.memory_space<smem>>) -> (i32, i32) {
    %c0_i32 = arith.constant 0 : i32
    %c0_i32_0 = arith.constant 0 : i32
    %c0_i32_1 = arith.constant 0 : i32
    return %c0_i32, %c0_i32_0 : i32, i32
  }
  func.func @transform_10(%arg0: i32, %arg1: memref<4xf32, #tpu.memory_space<smem>>) -> (i32, i32) {
    %c0_i32 = arith.constant 0 : i32
    %c0_i32_0 = arith.constant 0 : i32
    %c0_i32_1 = arith.constant 0 : i32
    return %c0_i32, %c0_i32_0 : i32, i32
  }
  func.func @transform_11(%arg0: i32, %arg1: memref<4xf32, #tpu.memory_space<smem>>) -> (i32, i32) {
    %c0_i32 = arith.constant 0 : i32
    %c0_i32_0 = arith.constant 0 : i32
    return %arg0, %c0_i32 : i32, i32
  }
}

module attributes {stable_mosaic.version = 11 : i64} {
  func.func @kernel(%arg0: i32, %arg1: memref<4xf32, #tpu.memory_space<smem>>, %arg2: memref<8x32xf32, #tpu.memory_space<vmem>>, %arg3: memref<32x512xbf16, #tpu.memory_space<vmem>>, %arg4: memref<1x512xf32, #tpu.memory_space<vmem>>, %arg5: memref<512x256xbf16, #tpu.memory_space<vmem>>, %arg6: memref<1x256xf32, #tpu.memory_space<vmem>>, %arg7: memref<256x128xbf16, #tpu.memory_space<vmem>>, %arg8: memref<1x128xf32, #tpu.memory_space<vmem>>, %arg9: memref<128x64xbf16, #tpu.memory_space<vmem>>, %arg10: memref<1x64xf32, #tpu.memory_space<vmem>>, %arg11: memref<1x64xf32, #tpu.memory_space<vmem>>, %arg12: memref<1x1xf32, #tpu.memory_space<vmem>>, %arg13: memref<8x1xf32, #tpu.memory_space<vmem>>) attributes {dimension_semantics = [#tpu.dimension_semantics<parallel>], iteration_bounds = array<i64: 1>, scalar_prefetch = 1 : i64, scratch_operands = 0 : i64, tpu.core_type = #tpu.core_type<tc>, window_params = [{transform_indices = @transform_0, window_bounds = array<i64: 8, 32>}, {pipeline_mode = #tpu.pipeline_mode<synchronous>, transform_indices = @transform_1, window_bounds = array<i64: 32, 512>}, {pipeline_mode = #tpu.pipeline_mode<synchronous>, transform_indices = @transform_2, window_bounds = array<i64: 1, 512>}, {pipeline_mode = #tpu.pipeline_mode<synchronous>, transform_indices = @transform_3, window_bounds = array<i64: 512, 256>}, {pipeline_mode = #tpu.pipeline_mode<synchronous>, transform_indices = @transform_4, window_bounds = array<i64: 1, 256>}, {pipeline_mode = #tpu.pipeline_mode<synchronous>, transform_indices = @transform_5, window_bounds = array<i64: 256, 128>}, {pipeline_mode = #tpu.pipeline_mode<synchronous>, transform_indices = @transform_6, window_bounds = array<i64: 1, 128>}, {pipeline_mode = #tpu.pipeline_mode<synchronous>, transform_indices = @transform_7, window_bounds = array<i64: 128, 64>}, {pipeline_mode = #tpu.pipeline_mode<synchronous>, transform_indices = @transform_8, window_bounds = array<i64: 1, 64>}, {pipeline_mode = #tpu.pipeline_mode<synchronous>, transform_indices = @transform_9, window_bounds = array<i64: 1, 64>}, {pipeline_mode = #tpu.pipeline_mode<synchronous>, transform_indices = @transform_10, window_bounds = array<i64: 1, 1>}, {transform_indices = @transform_11, window_bounds = array<i64: 8, 1>}]} {
    %c0 = arith.constant 0 : index
    %0 = memref.load %arg1[%c0] : memref<4xf32, #tpu.memory_space<smem>>
    %c1 = arith.constant 1 : index
    %1 = memref.load %arg1[%c1] : memref<4xf32, #tpu.memory_space<smem>>
    %c2 = arith.constant 2 : index
    %2 = memref.load %arg1[%c2] : memref<4xf32, #tpu.memory_space<smem>>
    %c3 = arith.constant 3 : index
    %3 = memref.load %arg1[%c3] : memref<4xf32, #tpu.memory_space<smem>>
    %c0_0 = arith.constant 0 : index
    %c0_1 = arith.constant 0 : index
    %4 = vector.load %arg2[%c0_0, %c0_1] : memref<8x32xf32, #tpu.memory_space<vmem>>, vector<8x32xf32>
    %5 = arith.truncf %4 : vector<8x32xf32> to vector<8x32xbf16>
    %c0_2 = arith.constant 0 : index
    %c0_3 = arith.constant 0 : index
    %6 = vector.load %arg3[%c0_2, %c0_3] : memref<32x512xbf16, #tpu.memory_space<vmem>>, vector<32x512xbf16>
    %cst = arith.constant dense<0.000000e+00> : vector<8x512xf32>
    %7 = tpu.matmul %5, %6, %cst {dimension_numbers = #tpu.dot_dimension_numbers<[1], [0], [0], [1], [0, 0, 1, 1], [], []>} : vector<8x32xbf16>, vector<32x512xbf16>, vector<8x512xf32> -> vector<8x512xf32>
    %c0_4 = arith.constant 0 : index
    %c0_5 = arith.constant 0 : index
    %8 = vector.load %arg4[%c0_4, %c0_5] : memref<1x512xf32, #tpu.memory_space<vmem>>, vector<1x512xf32>
    %9 = vector.broadcast %8 : vector<1x512xf32> to vector<8x512xf32>
    %10 = arith.addf %7, %9 : vector<8x512xf32>
    %11 = arith.truncf %10 : vector<8x512xf32> to vector<8x512xbf16>
    %cst_6 = arith.constant 0.000000e+00 : bf16
    %12 = vector.broadcast %cst_6 : bf16 to vector<8x512xbf16>
    %13 = arith.cmpf oge, %11, %12 : vector<8x512xbf16>
    %14 = arith.truncf %0 : f32 to bf16
    %15 = vector.broadcast %14 : bf16 to vector<8x512xbf16>
    %16 = arith.mulf %15, %11 : vector<8x512xbf16>
    %17 = arith.select %13, %11, %16 : vector<8x512xi1>, vector<8x512xbf16>
    %c0_7 = arith.constant 0 : index
    %c0_8 = arith.constant 0 : index
    %18 = vector.load %arg5[%c0_7, %c0_8] : memref<512x256xbf16, #tpu.memory_space<vmem>>, vector<512x256xbf16>
    %cst_9 = arith.constant dense<0.000000e+00> : vector<8x256xf32>
    %19 = tpu.matmul %17, %18, %cst_9 {dimension_numbers = #tpu.dot_dimension_numbers<[1], [0], [0], [1], [0, 0, 1, 1], [], []>} : vector<8x512xbf16>, vector<512x256xbf16>, vector<8x256xf32> -> vector<8x256xf32>
    %c0_10 = arith.constant 0 : index
    %c0_11 = arith.constant 0 : index
    %20 = vector.load %arg6[%c0_10, %c0_11] : memref<1x256xf32, #tpu.memory_space<vmem>>, vector<1x256xf32>
    %21 = vector.broadcast %20 : vector<1x256xf32> to vector<8x256xf32>
    %22 = arith.addf %19, %21 : vector<8x256xf32>
    %23 = arith.truncf %22 : vector<8x256xf32> to vector<8x256xbf16>
    %cst_12 = arith.constant 0.000000e+00 : bf16
    %24 = vector.broadcast %cst_12 : bf16 to vector<8x256xbf16>
    %25 = arith.cmpf oge, %23, %24 : vector<8x256xbf16>
    %26 = arith.truncf %1 : f32 to bf16
    %27 = vector.broadcast %26 : bf16 to vector<8x256xbf16>
    %28 = arith.mulf %27, %23 : vector<8x256xbf16>
    %29 = arith.select %25, %23, %28 : vector<8x256xi1>, vector<8x256xbf16>
    %c0_13 = arith.constant 0 : index
    %c0_14 = arith.constant 0 : index
    %30 = vector.load %arg7[%c0_13, %c0_14] : memref<256x128xbf16, #tpu.memory_space<vmem>>, vector<256x128xbf16>
    %cst_15 = arith.constant dense<0.000000e+00> : vector<8x128xf32>
    %31 = tpu.matmul %29, %30, %cst_15 {dimension_numbers = #tpu.dot_dimension_numbers<[1], [0], [0], [1], [0, 0, 1, 1], [], []>} : vector<8x256xbf16>, vector<256x128xbf16>, vector<8x128xf32> -> vector<8x128xf32>
    %c0_16 = arith.constant 0 : index
    %c0_17 = arith.constant 0 : index
    %32 = vector.load %arg8[%c0_16, %c0_17] : memref<1x128xf32, #tpu.memory_space<vmem>>, vector<1x128xf32>
    %33 = vector.broadcast %32 : vector<1x128xf32> to vector<8x128xf32>
    %34 = arith.addf %31, %33 : vector<8x128xf32>
    %35 = arith.truncf %34 : vector<8x128xf32> to vector<8x128xbf16>
    %cst_18 = arith.constant 0.000000e+00 : bf16
    %36 = vector.broadcast %cst_18 : bf16 to vector<8x128xbf16>
    %37 = arith.cmpf oge, %35, %36 : vector<8x128xbf16>
    %38 = arith.truncf %2 : f32 to bf16
    %39 = vector.broadcast %38 : bf16 to vector<8x128xbf16>
    %40 = arith.mulf %39, %35 : vector<8x128xbf16>
    %41 = arith.select %37, %35, %40 : vector<8x128xi1>, vector<8x128xbf16>
    %c0_19 = arith.constant 0 : index
    %c0_20 = arith.constant 0 : index
    %42 = vector.load %arg9[%c0_19, %c0_20] : memref<128x64xbf16, #tpu.memory_space<vmem>>, vector<128x64xbf16>
    %cst_21 = arith.constant dense<0.000000e+00> : vector<8x64xf32>
    %43 = tpu.matmul %41, %42, %cst_21 {dimension_numbers = #tpu.dot_dimension_numbers<[1], [0], [0], [1], [0, 0, 1, 1], [], []>} : vector<8x128xbf16>, vector<128x64xbf16>, vector<8x64xf32> -> vector<8x64xf32>
    %c0_22 = arith.constant 0 : index
    %c0_23 = arith.constant 0 : index
    %44 = vector.load %arg10[%c0_22, %c0_23] : memref<1x64xf32, #tpu.memory_space<vmem>>, vector<1x64xf32>
    %45 = vector.broadcast %44 : vector<1x64xf32> to vector<8x64xf32>
    %46 = arith.addf %43, %45 : vector<8x64xf32>
    %cst_24 = arith.constant 0.000000e+00 : f32
    %47 = vector.broadcast %cst_24 : f32 to vector<8x64xf32>
    %48 = arith.cmpf oge, %46, %47 : vector<8x64xf32>
    %49 = vector.broadcast %3 : f32 to vector<8x64xf32>
    %50 = arith.mulf %49, %46 : vector<8x64xf32>
    %51 = arith.select %48, %46, %50 : vector<8x64xi1>, vector<8x64xf32>
    %c0_25 = arith.constant 0 : index
    %c0_26 = arith.constant 0 : index
    %52 = vector.load %arg11[%c0_25, %c0_26] : memref<1x64xf32, #tpu.memory_space<vmem>>, vector<1x64xf32>
    %53 = vector.broadcast %52 : vector<1x64xf32> to vector<8x64xf32>
    %54 = arith.mulf %51, %53 : vector<8x64xf32>
    %cst_27 = arith.constant dense<0.000000e+00> : vector<8xf32>
    %55 = vector.multi_reduction <add>, %54, %cst_27 [1] : vector<8x64xf32> to vector<8xf32>
    %56 = vector.shape_cast %55 : vector<8xf32> to vector<8x1xf32>
    %c0_28 = arith.constant 0 : index
    %c0_29 = arith.constant 0 : index
    %57 = vector.load %arg12[%c0_28, %c0_29] : memref<1x1xf32, #tpu.memory_space<vmem>>, vector<1x1xf32>
    %58 = vector.broadcast %57 : vector<1x1xf32> to vector<8x1xf32>
    %59 = arith.addf %56, %58 : vector<8x1xf32>
    %c0_30 = arith.constant 0 : index
    %c0_31 = arith.constant 0 : index
    %60 = vector.load %arg13[%c0_30, %c0_31] : memref<8x1xf32, #tpu.memory_space<vmem>>, vector<8x1xf32>
    tpu.vector_store %arg13[%c0_30, %c0_31], %59 {strides = array<i32>} : memref<8x1xf32, #tpu.memory_space<vmem>>, vector<8x1xf32>,
    return
  }
  func.func @transform_0(%arg0: i32, %arg1: memref<4xf32, #tpu.memory_space<smem>>) -> (i32, i32) {
    %c0_i32 = arith.constant 0 : i32
    %c0_i32_0 = arith.constant 0 : i32
    return %arg0, %c0_i32 : i32, i32
  }
  func.func @transform_1(%arg0: i32, %arg1: memref<4xf32, #tpu.memory_space<smem>>) -> (i32, i32) {
    %c0_i32 = arith.constant 0 : i32
    %c0_i32_0 = arith.constant 0 : i32
    %c0_i32_1 = arith.constant 0 : i32
    return %c0_i32, %c0_i32_0 : i32, i32
  }
  func.func @transform_2(%arg0: i32, %arg1: memref<4xf32, #tpu.memory_space<smem>>) -> (i32, i32) {
    %c0_i32 = arith.constant 0 : i32
    %c0_i32_0 = arith.constant 0 : i32
    %c0_i32_1 = arith.constant 0 : i32
    return %c0_i32, %c0_i32_0 : i32, i32
  }
  func.func @transform_3(%arg0: i32, %arg1: memref<4xf32, #tpu.memory_space<smem>>) -> (i32, i32) {
    %c0_i32 = arith.constant 0 : i32
    %c0_i32_0 = arith.constant 0 : i32
    %c0_i32_1 = arith.constant 0 : i32
    return %c0_i32, %c0_i32_0 : i32, i32
  }
  func.func @transform_4(%arg0: i32, %arg1: memref<4xf32, #tpu.memory_space<smem>>) -> (i32, i32) {
    %c0_i32 = arith.constant 0 : i32
    %c0_i32_0 = arith.constant 0 : i32
    %c0_i32_1 = arith.constant 0 : i32
    return %c0_i32, %c0_i32_0 : i32, i32
  }
  func.func @transform_5(%arg0: i32, %arg1: memref<4xf32, #tpu.memory_space<smem>>) -> (i32, i32) {
    %c0_i32 = arith.constant 0 : i32
    %c0_i32_0 = arith.constant 0 : i32
    %c0_i32_1 = arith.constant 0 : i32
    return %c0_i32, %c0_i32_0 : i32, i32
  }
  func.func @transform_6(%arg0: i32, %arg1: memref<4xf32, #tpu.memory_space<smem>>) -> (i32, i32) {
    %c0_i32 = arith.constant 0 : i32
    %c0_i32_0 = arith.constant 0 : i32
    %c0_i32_1 = arith.constant 0 : i32
    return %c0_i32, %c0_i32_0 : i32, i32
  }
  func.func @transform_7(%arg0: i32, %arg1: memref<4xf32, #tpu.memory_space<smem>>) -> (i32, i32) {
    %c0_i32 = arith.constant 0 : i32
    %c0_i32_0 = arith.constant 0 : i32
    %c0_i32_1 = arith.constant 0 : i32
    return %c0_i32, %c0_i32_0 : i32, i32
  }
  func.func @transform_8(%arg0: i32, %arg1: memref<4xf32, #tpu.memory_space<smem>>) -> (i32, i32) {
    %c0_i32 = arith.constant 0 : i32
    %c0_i32_0 = arith.constant 0 : i32
    %c0_i32_1 = arith.constant 0 : i32
    return %c0_i32, %c0_i32_0 : i32, i32
  }
  func.func @transform_9(%arg0: i32, %arg1: memref<4xf32, #tpu.memory_space<smem>>) -> (i32, i32) {
    %c0_i32 = arith.constant 0 : i32
    %c0_i32_0 = arith.constant 0 : i32
    %c0_i32_1 = arith.constant 0 : i32
    return %c0_i32, %c0_i32_0 : i32, i32
  }
  func.func @transform_10(%arg0: i32, %arg1: memref<4xf32, #tpu.memory_space<smem>>) -> (i32, i32) {
    %c0_i32 = arith.constant 0 : i32
    %c0_i32_0 = arith.constant 0 : i32
    %c0_i32_1 = arith.constant 0 : i32
    return %c0_i32, %c0_i32_0 : i32, i32
  }
  func.func @transform_11(%arg0: i32, %arg1: memref<4xf32, #tpu.memory_space<smem>>) -> (i32, i32) {
    %c0_i32 = arith.constant 0 : i32
    %c0_i32_0 = arith.constant 0 : i32
    return %arg0, %c0_i32 : i32, i32
  }
}

</mosaic_0001>

<bundles_post_ra>
// kernel: tpu_custom_call.1
= control target key start
LH: loop header
LB: loop body
LE: loop exit
PB: predicated region body
PF: predicated region fallthrough
CT: control target
= control target key end

     0   :  { %s1630_s0 = inlined_call_operand.vmem [shape: f32[4], index: 0, kind: input, shape index: {}]   ;;  %s1631_s1 = inlined_call_operand.vmem [shape: f32[8,32], index: 1, kind: input, shape index: {}]   ;;  %s1632_s2 = inlined_call_operand.vmem [shape: bf16[32,512], index: 2, kind: input, shape index: {}]   ;;  %s1633_s3 = inlined_call_operand.vmem [shape: f32[1,512], index: 3, kind: input, shape index: {}]   ;;  %s1634_s4 = inlined_call_operand.hbm [shape: bf16[512,256], index: 4, kind: input, shape index: {}]   ;;  %s1635_s5 = inlined_call_operand.vmem [shape: f32[1,256], index: 5, kind: input, shape index: {}]   ;;  %s1636_s6 = inlined_call_operand.hbm [shape: bf16[256,128], index: 6, kind: input, shape index: {}]   ;;  %s1637_s7 = inlined_call_operand.vmem [shape: f32[1,128], index: 7, kind: input, shape index: {}]   ;;  %s1638_s8 = inlined_call_operand.vmem [shape: bf16[128,64], index: 8, kind: input, shape index: {}]   ;;  %s1639_s9 = inlined_call_operand.vmem [shape: f32[1,64], index: 9, kind: input, shape index: {}]   ;;  %s1640_s10 = inlined_call_operand.vmem [shape: f32[1,64], index: 10, kind: input, shape index: {}]   ;;  %s1641_s12 = inlined_call_operand.vmem [shape: f32[8,1], index: 12, kind: output, shape index: {}]   ;;  %s1642_s11 = inlined_call_operand.<no memory space> [shape: f32[1,1], index: 11, kind: input, shape index: {}]  }
   0x1   :  { %s17_s23 = sshll.u32 %s1630_s0, 4  ;;  %v21_v0 = vstv %s1642_s11  ;;  %s18_s23 = int_to_ptr.vmem [resolvable:$true] %s17_s23 }
   0x2   :  { %22 = vst [vmem:[#allocation4] sm:$0x1] %v21_v0  ;;  %s1402_s26 = scalar_lea.vmem %s18_s23, 16  ;;  %p1407_p1 = scmp.lt.s32.totalorder %s18_s23, %s18_s23 }
   0x3   :  { %p1403_p0 = scmp.ne.s32.totalorder %s18_s23, %s1402_s26  ;;  %p1408_p2 = scmp.lt.s32.totalorder %s1402_s26, %s1402_s26 }
   0x5   :  { %p1409_p3 = por %p1408_p2, %p1407_p1 }
   0x7   :  { %p1410_p4 = pnand %p1409_p3, %p1403_p0 }
   0x9   :  { %1413 = shalt.err (!%p1410_p4)  }
   0xa   :  { %s1460_s27 = smov [#allocation3]  }
   0xb   :  { %20 = dma.vmem_to_smem %s18_s23, 16, %s1460_s27, [#allocation2] }
   0xc   :  { %1454 = dma.done.wait [#allocation2], 16 }
   0xd   :  { %1455 = vsyncadd [#allocation2], 4294967280 }
   0xe   :  { %24 = sfence }
   0xf   :  { %25 = vsyncpa [#allocation6], 0 }
  0x10   :  { %26 = vsyncpa [#allocation8], 0  ;;  %s1461_s0 = smov [#allocation5]  }
  0x11   :  { %s38_s28 = sshll.u32 %s1461_s0, 4  ;;  %s39_s28 = int_to_ptr.vmem [resolvable:$true] %s38_s28 }
  0x12   :  { %s1422_s11 = scalar_lea.vmem %s39_s28, 8192  ;;  %p1427_p6 = scmp.lt.s32.totalorder %s39_s28, %s39_s28 }
  0x13   :  { %p1423_p5 = scmp.ne.s32.totalorder %s39_s28, %s1422_s11  ;;  %p1428_p7 = scmp.lt.s32.totalorder %s1422_s11, %s1422_s11 }
  0x15   :  { %p1429_p8 = por %p1428_p7, %p1427_p6 }
  0x17   :  { %p1430_p9 = pnand %p1429_p8, %p1423_p5 }
  0x19   :  { %1433 = shalt.err (!%p1430_p9)
}
  0x1a   :  { %s1462_s29 = smov 128   ;;  %s1463_s30 = smov 8  }
  0x1b   :  { %44 = dma.hbm_to_vmem [thread:$0]  %s1634_s4, 8192, %s39_s28, [#allocation6], %s1462_s29, %s1462_s29, %s1463_s30  }
  0x1c   :  { %s1464_s15 = smov [#allocation7]  }
  0x1d   :  { %s52_s16 = sshll.u32 %s1464_s15, 4  ;;  %s53_s16 = int_to_ptr.vmem [resolvable:$true] %s52_s16 }
  0x1e   :  { %s1442_s17 = scalar_lea.vmem %s53_s16, 2048  ;;  %p1447_p11 = scmp.lt.s32.totalorder %s53_s16, %s53_s16 }
  0x1f   :  { %p1443_p10 = scmp.ne.s32.totalorder %s53_s16, %s1442_s17  ;;  %p1448_p12 = scmp.lt.s32.totalorder %s1442_s17, %s1442_s17 }
  0x21   :  { %p1449_p13 = por %p1448_p12, %p1447_p11 }
  0x23   :  { %p1450_p0 = pnand %p1449_p13, %p1443_p10 }
  0x25   :  { %1453 = shalt.err (!%p1450_p0)
}
  0x26   :  { %s1465_s18 = smov 64   ;;  %s1466_s19 = smov 4  }
  0x27   :  { %58 = dma.hbm_to_vmem [thread:$0]  %s1636_s6, 2048, %s53_s16, [#allocation8], %s1465_s18, %s1465_s18, %s1466_s19  }
  0x28   :  { %1456 = dma.done.wait [#allocation6], 8192  }
  0x29   :  { %1457 = vsyncadd [#allocation6], 4294959104 }
  0x2a   :  { %1458 = dma.done.wait [#allocation8], 2048  }
  0x2b   :  { %1459 = vsyncadd [#allocation8], 4294965248  ;;  %v1467_v1 = vmov 0   ;;  %v1270_v2 = vld [vmem:[%s1632_s2 + $0x24] ss:$16 sps:$4 sm:$0xff]   ;;  %vm152_vm0 = vcmask 261120  }
  0x2c   :  { %188 = vmatprep.mubr.bf16.mxu0 %v1467_v1  ;;  %229 = vmatprep.mubr.bf16.mxu1 %v1467_v1  ;;  %v1272_v3 = vld [vmem:[%s1632_s2 + $0x2c] ss:$16 sps:$4 sm:$0xff]   ;;  %v1274_v4 = vld [vmem:[%s1632_s2 + $0x20] ss:$16 sps:$4 sm:$0xff]   ;;  %v1275_v5 = vld [vmem:[%s1632_s2 + $0x28] ss:$16 sps:$4 sm:$0xff]  }
  0x2d   :  { %168 = vmatprep.subr.bf16.mxu0 %v1270_v2  ;;  %209 = vmatprep.subr.bf16.mxu1 %v1272_v3  ;;  %v1276_v6 = vld [vmem:[%s1632_s2 + $0x4] ss:$16 sps:$4 sm:$0xff]   ;;  %v1278_v7 = vld [vmem:[%s1632_s2 + $0xc] ss:$16 sps:$4 sm:$0xff]   ;;  %v1280_v8 = vld [vmem:[%s1632_s2] ss:$16 sps:$4 sm:$0xff]  }
  0x2e   :  { %169 = vmatpush1.bf16.msra.mxu0 %v1274_v4  ;;  %210 = vmatpush1.bf16.msra.mxu1 %v1275_v5  ;;  %v1281_v9 = vld [vmem:[%s1632_s2 + $0x8] ss:$16 sps:$4 sm:$0xff]   ;;  %v80_v10 = vld [vmem:[%s1631_s1] sm:$0xff]  ;;  %s76_s1 = sld [smem:[#allocation3]]  ;;  %vm1469_vm7 = vmmov 0   ;;  %vm1084_vm10 = vcmask 523264  }
  0x2f   :  { %170 = vmatprep.subr.bf16.mxu0 %v1276_v6  ;;  %211 = vmatprep.subr.bf16.mxu1 %v1278_v7  ;;  %v1282_v11 = vld [vmem:[#allocation5 + $0x70] ss:$8 sps:$4 sm:$0xff]   ;;  %v1284_v12 = vld [vmem:[#allocation5 + $0x74] ss:$8 sps:$4 sm:$0xff]   ;;  %v81_v13 = vpack.c.bf16 %v80_v10, %v80_v10  ;;  %v1290_v16 = vld [vmem:[#allocation5 + $0x64] ss:$8 sps:$4 sm:$0xff]  }
  0x30   :  { %v1285_v14 = vld [vmem:[#allocation5 + $0x170] ss:$8 sps:$4 sm:$0xff]   ;;  %v1287_v15 = vld [vmem:[#allocation5 + $0x174] ss:$8 sps:$4 sm:$0xff]   ;;  %v1293_v17 = vld [vmem:[#allocation5 + $0x164] ss:$8 sps:$4 sm:$0xff]  }
  0x31   :  { %v1288_v18 = vld [vmem:[#allocation5 + $0x60] ss:$8 sps:$4 sm:$0xff]   ;;  %v1296_v20 = vld [vmem:[#allocation5 + $0x54] ss:$8 sps:$4 sm:$0xff]   ;;  %v1294_v22 = vld [vmem:[#allocation5 + $0x50] ss:$8 sps:$4 sm:$0xff]  }
  0x32   :  { %171 = vmatpush1.bf16.msra.mxu0 %v1280_v8  ;;  %212 = vmatpush1.bf16.msra.mxu1 %v1281_v9  ;;  %v1291_v19 = vld [vmem:[#allocation5 + $0x160] ss:$8 sps:$4 sm:$0xff]   ;;  %v1299_v21 = vld [vmem:[#allocation5 + $0x154] ss:$8 sps:$4 sm:$0xff]   ;;  %v1297_v23 = vld [vmem:[#allocation5 + $0x150] ss:$8 sps:$4 sm:$0xff]  }
  0x33   :  { %664 = vmatprep.subr.bf16.mxu0 %v1284_v12  ;;  %705 = vmatprep.subr.bf16.mxu1 %v1287_v15  ;;  %v1302_v24 = vld [vmem:[#allocation5 + $0x44] ss:$8 sps:$4 sm:$0xff]   ;;  %v1300_v26 = vld [vmem:[#allocation5 + $0x40] ss:$8 sps:$4 sm:$0xff]   ;;  %v1308_v28 = vld [vmem:[#allocation5 + $0x34] ss:$8 sps:$4 sm:$0xff]  }
  0x34   :  { %v1305_v25 = vld [vmem:[#allocation5 + $0x144] ss:$8 sps:$4 sm:$0xff]   ;;  %v1303_v27 = vld [vmem:[#allocation5 + $0x140] ss:$8 sps:$4 sm:$0xff]   ;;  %v1311_v29 = vld [vmem:[#allocation5 + $0x134] ss:$8 sps:$4 sm:$0xff]   ;;  %p247_p1 = scmp.ne.f32.partialorder %s76_s1, %s76_s1 }
  0x35   :  { %1115 = vmatmul.mubr.msk.bf16.vlgmr.msra.gmra.mxu0 %vm152_vm0, %v81_v13  ;;  %1116 = vmatmul.mubr.msk.bf16.vlgmr.msra.gmra.mxu1 %vm152_vm0, %v81_v13  ;;  %v1306_v30 = vld [vmem:[#allocation5 + $0x30] ss:$8 sps:$4 sm:$0xff]   ;;  %v1314_v32 = vld [vmem:[#allocation5 + $0x24] ss:$8 sps:$4 sm:$0xff]   ;;  %v1312_v34 = vld [vmem:[#allocation5 + $0x20] ss:$8 sps:$4 sm:$0xff]   ;;  %v92_v13 = vlaneseq }
  0x36   :  { %665 = vmatpush1.bf16.msra.mxu0 %v1282_v11  ;;  %706 = vmatpush1.bf16.msra.mxu1 %v1285_v14  ;;  %v1309_v31 = vld [vmem:[#allocation5 + $0x130] ss:$8 sps:$4 sm:$0xff]   ;;  %v1317_v33 = vld [vmem:[#allocation5 + $0x124] ss:$8 sps:$4 sm:$0xff]   ;;  %v1315_v35 = vld [vmem:[#allocation5 + $0x120] ss:$8 sps:$4 sm:$0xff]  }
  0x37   :  { %666 = vmatprep.subr.bf16.mxu0 %v1290_v16  ;;  %707 = vmatprep.subr.bf16.mxu1 %v1293_v17  ;;  %v1320_v36 = vld [vmem:[#allocation5 + $0x14] ss:$8 sps:$4 sm:$0xff]   ;;  %v1318_v38 = vld [vmem:[#allocation5 + $0x10] ss:$8 sps:$4 sm:$0xff]   ;;  %v1326_v40 = vld [vmem:[#allocation5 + $0x4] ss:$8 sps:$4 sm:$0xff]  }
  0x38   :  { %v1323_v37 = vld [vmem:[#allocation5 + $0x114] ss:$8 sps:$4 sm:$0xff]   ;;  %v1321_v39 = vld [vmem:[#allocation5 + $0x110] ss:$8 sps:$4 sm:$0xff]   ;;  %v1329_v41 = vld [vmem:[#allocation5 + $0x104] ss:$8 sps:$4 sm:$0xff]  }
  0x39   :  { %v1324_v42 = vld [vmem:[#allocation5] ss:$8 sps:$4 sm:$0xff]   ;;  %v1332_v44 = vld [vmem:[#allocation5 + $0xf4] ss:$8 sps:$4 sm:$0xff]   ;;  %v1330_v46 = vld [vmem:[#allocation5 + $0xf0] ss:$8 sps:$4 sm:$0xff]  }
  0x3a   :  { %667 = vmatpush1.bf16.msra.mxu0 %v1288_v18  ;;  %708 = vmatpush1.bf16.msra.mxu1 %v1291_v19  ;;  %v1327_v43 = vld [vmem:[#allocation5 + $0x100] ss:$8 sps:$4 sm:$0xff]   ;;  %v1335_v45 = vld [vmem:[#allocation5 + $0x1f4] ss:$8 sps:$4 sm:$0xff]   ;;  %v1333_v47 = vld [vmem:[#allocation5 + $0x1f0] ss:$8 sps:$4 sm:$0xff]  }
  0x3b   :  { %668 = vmatprep.subr.bf16.mxu0 %v1296_v20  ;;  %709 = vmatprep.subr.bf16.mxu1 %v1299_v21  ;;  %v1338_v48 = vld [vmem:[#allocation5 + $0xe4] ss:$8 sps:$4 sm:$0xff]   ;;  %v1336_v50 = vld [vmem:[#allocation5 + $0xe0] ss:$8 sps:$4 sm:$0xff]   ;;  %v1344_v52 = vld [vmem:[#allocation5 + $0xd4] ss:$8 sps:$4 sm:$0xff]  }
  0x3c   :  { %v1341_v49 = vld [vmem:[#allocation5 + $0x1e4] ss:$8 sps:$4 sm:$0xff]   ;;  %v1339_v51 = vld [vmem:[#allocation5 + $0x1e0] ss:$8 sps:$4 sm:$0xff]   ;;  %v1347_v53 = vld [vmem:[#allocation5 + $0x1d4] ss:$8 sps:$4 sm:$0xff]  }
  0x3d   :  { %v1342_v54 = vld [vmem:[#allocation5 + $0xd0] ss:$8 sps:$4 sm:$0xff]   ;;  %v1350_v56 = vld [vmem:[#allocation5 + $0xc4] ss:$8 sps:$4 sm:$0xff]   ;;  %v1348_v58 = vld [vmem:[#allocation5 + $0xc0] ss:$8 sps:$4 sm:$0xff]  }
  0x3e   :  { %669 = vmatpush1.bf16.msra.mxu0 %v1294_v22  ;;  %710 = vmatpush1.bf16.msra.mxu1 %v1297_v23  ;;  %v1345_v55 = vld [vmem:[#allocation5 + $0x1d0] ss:$8 sps:$4 sm:$0xff]   ;;  %v1353_v57 = vld [vmem:[#allocation5 + $0x1c4] ss:$8 sps:$4 sm:$0xff]   ;;  %v1351_v59 = vld [vmem:[#allocation5 + $0x1c0] ss:$8 sps:$4 sm:$0xff]  }
  0x3f   :  { %670 = vmatprep.subr.bf16.mxu0 %v1302_v24  ;;  %711 = vmatprep.subr.bf16.mxu1 %v1305_v25  ;;  %v1356_v60 = vld [vmem:[#allocation5 + $0xb4] ss:$8 sps:$4 sm:$0xff]   ;;  %v1354_v62 = vld [vmem:[#allocation5 + $0xb0] ss:$8 sps:$4 sm:$0xff]   ;;  %v1362_v0 = vld [vmem:[#allocation5 + $0xa4] ss:$8 sps:$4 sm:$0xff]  }
  0x40   :  { %v1359_v61 = vld [vmem:[#allocation5 + $0x1b4] ss:$8 sps:$4 sm:$0xff]   ;;  %v1357_v63 = vld [vmem:[#allocation5 + $0x1b0] ss:$8 sps:$4 sm:$0xff]   ;;  %v1365_v1 = vld [vmem:[#allocation5 + $0x1a4] ss:$8 sps:$4 sm:$0xff]  }
  0x41   :  { %v1360_v2 = vld [vmem:[#allocation5 + $0xa0] ss:$8 sps:$4 sm:$0xff]   ;;  %v1368_v4 = vld [vmem:[#allocation5 + $0x94] ss:$8 sps:$4 sm:$0xff]   ;;  %v1366_v6 = vld [vmem:[#allocation5 + $0x90] ss:$8 sps:$4 sm:$0xff]  }
  0x42   :  { %671 = vmatpush1.bf16.msra.mxu0 %v1300_v26  ;;  %712 = vmatpush1.bf16.msra.mxu1 %v1303_v27  ;;  %v1363_v3 = vld [vmem:[#allocation5 + $0x1a0] ss:$8 sps:$4 sm:$0xff]   ;;  %v1371_v5 = vld [vmem:[#allocation5 + $0x194] ss:$8 sps:$4 sm:$0xff]   ;;  %v1369_v7 = vld [vmem:[#allocation5 + $0x190] ss:$8 sps:$4 sm:$0xff]  }
  0x43   :  { %672 = vmatprep.subr.bf16.mxu0 %v1308_v28  ;;  %713 = vmatprep.subr.bf16.mxu1 %v1311_v29  ;;  %v1374_v8 = vld [vmem:[#allocation5 + $0x84] ss:$8 sps:$4 sm:$0xff]   ;;  %v1372_v10 = vld [vmem:[#allocation5 + $0x80] ss:$8 sps:$4 sm:$0xff]   ;;  %v1378_v12 = vld [vmem:[#allocation7 + $0x78] sm:$0xff]   ;;  %s248_s2 = sshrl.u32 %s76_s1, 16 }
  0x44   :  { %v1377_v9 = vld [vmem:[#allocation5 + $0x184] ss:$8 sps:$4 sm:$0xff]   ;;  %v1375_v11 = vld [vmem:[#allocation5 + $0x180] ss:$8 sps:$4 sm:$0xff]   ;;  %s249_s18 = sand.u32 1, %s248_s2  ;;  %v1574_v14 = vshrl.u32 %v92_v13, 7 }
  0x45   :  { %s250_s19 = sadd.s32 32767, %s249_s18  ;;  %v90_v17 = vld [vmem:[%s1633_s3] sm:$0xf]  ;;  %s1104_s14 = sld [smem:[#allocation3 + $0x1]]  ;;  %vm1096_vm11 = vcmask 7168  }
  0x46   :  { %673 = vmatpush1.bf16.msra.mxu0 %v1306_v30  ;;  %714 = vmatpush1.bf16.msra.mxu1 %v1309_v31  ;;  %s251_s20 = sadd.s32 %s250_s19, %s76_s1  ;;  %v94_v15 = vsub.s32 0, %v1574_v14  ;;  %v102_v16 = vsub.s32 2, %v1574_v14  ;;  %v98_v18 = vsub.s32 1, %v1574_v14  ;;  %v106_v19 = vsub.s32 3, %v1574_v14  ;;  %s1105_s26 = sld [smem:[#allocation3 + $0x2]] }
  0x47   :  { %674 = vmatprep.subr.bf16.mxu0 %v1314_v32  ;;  %715 = vmatprep.subr.bf16.mxu1 %v1317_v33  ;;  %s252_s21 = sand.u32 4294901760, %s251_s20 }
  0x48   :  { %s1644_s21 = smov (%p247_p1, %s252_s21), 2143289344  ;;  %v95_v20 = vrot.slane %v90_v17, %v94_v15  ;;  %v103_v21 = vrot.slane %v90_v17, %v102_v16  ;;  %v99_v22 = vrot.slane %v90_v17, %v98_v18  ;;  %v107_v23 = vrot.slane %v90_v17, %v106_v19 }
  0x49   :  { %s255_s23 = sshrl.u32 %s1644_s21, 16 }
  0x4a   :  { %675 = vmatpush1.bf16.msra.mxu0 %v1312_v34  ;;  %716 = vmatpush1.bf16.msra.mxu1 %v1315_v35  ;;  %s256_s24 = sshll.u32 %s255_s23, 16 }
  0x4b   :  { %676 = vmatprep.subr.bf16.mxu0 %v1320_v36  ;;  %717 = vmatprep.subr.bf16.mxu1 %v1323_v37  ;;  %s257_s25 = sor.u32 %s256_s24, %s255_s23  ;;  %s752_s15 = sshrl.u32 %s1104_s14, 16 }
  0x4c   :  { %v258_v34 = vstv %s257_s25  ;;  %s753_s16 = sand.u32 1, %s752_s15  ;;  %p751_p2 = scmp.ne.f32.partialorder %s1104_s14, %s1104_s14 }
  0x4d   :  { %s754_s17 = sadd.s32 32767, %s753_s16  ;;  %s947_s6 = sshrl.u32 %s1105_s26, 16 }
  0x4e   :  { %677 = vmatpush1.bf16.msra.mxu0 %v1318_v38  ;;  %718 = vmatpush1.bf16.msra.mxu1 %v1321_v39  ;;  %s755_s1 = sadd.s32 %s1104_s14, %s754_s17  ;;  %s948_s27 = sand.u32 1, %s947_s6 }
  0x4f   :  { %678 = vmatprep.subr.bf16.mxu0 %v1326_v40  ;;  %719 = vmatprep.subr.bf16.mxu1 %v1329_v41  ;;  %s756_s2 = sand.u32 4294901760, %s755_s1  ;;  %s949_s0 = sadd.s32 32767, %s948_s27 }
  0x50   :  { %s1646_s2 = smov (%p751_p2, %s756_s2), 2143289344  ;;  %s950_s28 = sadd.s32 %s1105_s26, %s949_s0 }
  0x51   :  { %s759_s20 = sshrl.u32 %s1646_s2, 16  ;;  %p946_p3 = scmp.ne.f32.partialorder %s1105_s26, %s1105_s26 }
  0x52   :  { %679 = vmatpush1.bf16.msra.mxu0 %v1324_v42  ;;  %720 = vmatpush1.bf16.msra.mxu1 %v1327_v43  ;;  %s760_s21 = sshll.u32 %s759_s20, 16  ;;  %s951_s11 = sand.u32 4294901760, %s950_s28 }
  0x53   :  { %680 = vmatprep.subr.bf16.mxu0 %v1332_v44  ;;  %721 = vmatprep.subr.bf16.mxu1 %v1335_v45  ;;  %v1379_v45 = vld [vmem:[#allocation7 + $0x38] sm:$0xff]   ;;  %s761_s4 = sor.u32 %s760_s21, %s759_s20  ;;  %s1648_s11 = smov (%p946_p3, %s951_s11), 2143289344 }
  0x54   :  { %s954_s29 = sshrl.u32 %s1648_s11, 16  ;;  %s1106_s15 = sld [smem:[#allocation3 + $0x3]] }
  0x55   :  { %s955_s30 = sshll.u32 %s954_s29, 16 }
  0x56   :  { %681 = vmatpush2.bf16.msra.mxu0 %v1330_v46  ;;  %722 = vmatpush2.bf16.msra.mxu1 %v1333_v47 }
  0x57   :  { %682 = vmatprep.subr.bf16.mxu0 %v1338_v48  ;;  %723 = vmatprep.subr.bf16.mxu1 %v1341_v49  ;;  %v1380_v48 = vld [vmem:[#allocation7 + $0x70] sm:$0xff]  }
  0x5a   :  { %683 = vmatpush2.bf16.msra.mxu0 %v1336_v50  ;;  %724 = vmatpush2.bf16.msra.mxu1 %v1339_v51  ;;  %v1381_v51 = vld [vmem:[#allocation7 + $0x30] sm:$0xff]  }
  0x5b   :  { %684 = vmatprep.subr.bf16.mxu0 %v1344_v52  ;;  %725 = vmatprep.subr.bf16.mxu1 %v1347_v53  ;;  %v1382_v52 = vld [vmem:[#allocation7 + $0x68] sm:$0xff]  }
  0x5c   :  { %v1383_v53 = vld [vmem:[#allocation7 + $0x28] sm:$0xff]  }
  0x5e   :  { %685 = vmatpush2.bf16.msra.mxu0 %v1342_v54  ;;  %726 = vmatpush2.bf16.msra.mxu1 %v1345_v55  ;;  %v1384_v54 = vld [vmem:[#allocation7 + $0x60] sm:$0xff]  }
  0x5f   :  { %686 = vmatprep.subr.bf16.mxu0 %v1350_v56  ;;  %727 = vmatprep.subr.bf16.mxu1 %v1353_v57  ;;  %v1385_v55 = vld [vmem:[#allocation7 + $0x20] sm:$0xff]   ;;  %v1386_v56 = vld [vmem:[#allocation7 + $0x58] sm:$0xff]  }
  0x60   :  { %v1387_v57 = vld [vmem:[#allocation7 + $0x18] sm:$0xff]  }
  0x62   :  { %687 = vmatpush2.bf16.msra.mxu0 %v1348_v58  ;;  %728 = vmatpush2.bf16.msra.mxu1 %v1351_v59  ;;  %v1388_v58 = vld [vmem:[#allocation7 + $0x50] sm:$0xff]  }
  0x63   :  { %688 = vmatprep.subr.bf16.mxu0 %v1356_v60  ;;  %729 = vmatprep.subr.bf16.mxu1 %v1359_v61  ;;  %v1389_v59 = vld [vmem:[#allocation7 + $0x10] sm:$0xff]   ;;  %v1390_v60 = vld [vmem:[#allocation7 + $0x48] sm:$0xff]  }
  0x64   :  { %v1391_v61 = vld [vmem:[#allocation7 + $0x8] sm:$0xff]  }
  0x66   :  { %689 = vmatpush2.bf16.msra.mxu0 %v1354_v62  ;;  %730 = vmatpush2.bf16.msra.mxu1 %v1357_v63  ;;  %v1392_v62 = vld [vmem:[#allocation7 + $0x40] sm:$0xff]  }
  0x67   :  { %690 = vmatprep.subr.bf16.mxu0 %v1362_v0  ;;  %731 = vmatprep.subr.bf16.mxu1 %v1365_v1  ;;  %v1393_v63 = vld [vmem:[#allocation7] sm:$0xff]   ;;  %v1394_v0 = vld [vmem:[%s1638_s8 + $0x38] sm:$0xff]   ;;  %v1468_v1 = vmov 0.0  }
  0x6a   :  { %691 = vmatpush2.bf16.msra.mxu0 %v1360_v2  ;;  %732 = vmatpush2.bf16.msra.mxu1 %v1363_v3  ;;  %v1395_v2 = vld [vmem:[%s1638_s8 + $0x30] sm:$0xff]   ;;  %v1396_v3 = vld [vmem:[%s1638_s8 + $0x28] sm:$0xff]  }
  0x6b   :  { %692 = vmatprep.subr.bf16.mxu0 %v1368_v4  ;;  %733 = vmatprep.subr.bf16.mxu1 %v1371_v5  ;;  %v1397_v4 = vld [vmem:[%s1638_s8 + $0x20] sm:$0xff]   ;;  %v1398_v5 = vld [vmem:[%s1638_s8 + $0x18] sm:$0xff]  }
  0x6e   :  { %693 = vmatpush2.bf16.msra.mxu0 %v1366_v6  ;;  %734 = vmatpush2.bf16.msra.mxu1 %v1369_v7  ;;  %v332_v6 = vld [vmem:[%s1635_s5] sm:$0x3] }
  0x6f   :  { %694 = vmatprep.subr.bf16.mxu0 %v1374_v8  ;;  %735 = vmatprep.subr.bf16.mxu1 %v1377_v9  ;;  %v337_v7 = vrot.slane %v332_v6, %v94_v15  ;;  %v341_v8 = vrot.slane %v332_v6, %v98_v18 }
  0x72   :  { %695 = vmatpush2.bf16.msra.mxu0 %v1372_v10  ;;  %736 = vmatpush2.bf16.msra.mxu1 %v1375_v11 }
  0x73   :  { %1209 = vmatprep.subr.bf16.mxu0 %v1378_v12  ;;  %1240 = vmatprep.subr.bf16.mxu1 %v1468_v1 }
  0xf5   :  { %v190_v24 = vpop.f32.mrf.mxu0  ;;  %v231_v25 = vpop.f32.mrf.mxu1 }
  0xf6   :  { %v191_v26 = vadd.f32 %v190_v24, %v95_v20  ;;  %v232_v27 = vadd.f32 %v231_v25, %v103_v21 }
  0xf7   :  { %v192_v28 = vpop.f32.mrf.mxu0  ;;  %v233_v29 = vpop.f32.mrf.mxu1 }
  0xf8   :  { %v238_v30 = vpack.c.bf16 %v191_v26, %v191_v26  ;;  %v240_v31 = vpack.c.bf16 %v232_v27, %v232_v27  ;;  %v193_v32 = vadd.f32 %v192_v28, %v99_v22  ;;  %v234_v33 = vadd.f32 %v233_v29, %v107_v23  ;;  %v1399_v28 = vld [vmem:[%s1638_s8 + $0x10] sm:$0xff]   ;;  %v1400_v29 = vld [vmem:[%s1638_s8 + $0x8] sm:$0xff]  }
  0xf9   :  { %v194_v35 = vpop.f32.mrf.mxu0  ;;  %v235_v36 = vpop.f32.mrf.mxu1  ;;  %v762_v22 = vstv %s761_s4 }
  0xfa   :  { %v239_v37 = vpack.c.bf16 %v193_v32, %v193_v32  ;;  %v241_v38 = vpack.c.bf16 %v234_v33, %v234_v33  ;;  %vm242_vm1 = vcmp.ge.bf16.partialorder %v238_v30, 0  ;;  %v260_v41 = vmul.bf16 %v258_v34, %v238_v30  ;;  %v1181_v32 = vld [vmem:[%s1637_s7] ss:$0 sm:$0xff] }
  0xfb   :  { %v195_v39 = vpop.f32.mrf.mxu0  ;;  %v236_v40 = vpop.f32.mrf.mxu1  ;;  %vm244_vm2 = vcmp.ge.bf16.partialorder %v240_v31, 0  ;;  %v262_v42 = vmul.bf16 %v258_v34, %v240_v31 }
  0xfc   :  { %v261_v43 = vmul.bf16 %v258_v34, %v239_v37  ;;  %v263_v44 = vmul.bf16 %v258_v34, %v241_v38  ;;  %vm243_vm3 = vcmp.ge.bf16.partialorder %v239_v37, 0  ;;  %vm245_vm4 = vcmp.ge.bf16.partialorder %v241_v38, 0 }
  0xfd   :  { %v264_v49 = vsel %vm242_vm1, %v238_v30, %v260_v41  ;;  %v266_v50 = vsel %vm244_vm2, %v240_v31, %v262_v42  ;;  %v1401_v30 = vld [vmem:[%s1638_s8] sm:$0xff]   ;;  %s956_s8 = sor.u32 %s955_s30, %s954_s29 }
  0xfe   :  { %v265_v46 = vsel %vm243_vm3, %v239_v37, %v261_v43  ;;  %v267_v47 = vsel %vm245_vm4, %v241_v38, %v263_v44  ;;  %v957_v37 = vstv %s956_s8  ;;  %v1198_v42 = vld [vmem:[%s1639_s9] ss:$0 sm:$0xff]  ;;  %v1073_v44 = vstv %s1106_s15 }
  0xff   :  { %696 = vmatprep.mubr.bf16.mxu0 %v265_v46  ;;  %737 = vmatprep.mubr.bf16.mxu1 %v267_v47 }
 0x100   :  { %697 = vmatmul.mubr.bf16.vlgmr.msra.gmra.mxu0 %v264_v49  ;;  %738 = vmatmul.mubr.bf16.vlgmr.msra.gmra.mxu1 %v266_v50 }
 0x101   :  { %1210 = vmatpush3.bf16.msra.mxu0 %v1379_v45  ;;  %1241 = vmatpush3.bf16.msra.mxu1 %v1394_v0 }
 0x102   :  { %1211 = vmatprep.subr.bf16.mxu0 %v1380_v48  ;;  %1242 = vmatprep.subr.bf16.mxu1 %v1468_v1  ;;  %v1207_v48 = vld [vmem:[%s1640_s10] ss:$0 sm:$0xff] }
 0x103   :  { %1256 = vmatprep.mubr.msk.bf16.mxu1 %vm1469_vm7, %v1468_v1 }
 0x105   :  { %1212 = vmatpush3.bf16.msra.mxu0 %v1381_v51  ;;  %1243 = vmatpush3.bf16.msra.mxu1 %v1395_v2 }
 0x106   :  { %1213 = vmatprep.subr.bf16.mxu0 %v1382_v52  ;;  %1244 = vmatprep.subr.bf16.mxu1 %v1468_v1 }
 0x109   :  { %1214 = vmatpush3.bf16.msra.mxu0 %v1383_v53  ;;  %1245 = vmatpush3.bf16.msra.mxu1 %v1396_v3 }
 0x10a   :  { %1215 = vmatprep.subr.bf16.mxu0 %v1384_v54  ;;  %1246 = vmatprep.subr.bf16.mxu1 %v1468_v1  ;;  %v1208_v54 = vld [vmem:[#allocation4] ss:$0 sm:$0xff] }
 0x10d   :  { %1216 = vmatpush3.bf16.msra.mxu0 %v1385_v55  ;;  %1247 = vmatpush3.bf16.msra.mxu1 %v1397_v4 }
 0x10e   :  { %1217 = vmatprep.subr.bf16.mxu0 %v1386_v56  ;;  %1248 = vmatprep.subr.bf16.mxu1 %v1468_v1 }
 0x111   :  { %1218 = vmatpush3.bf16.msra.mxu0 %v1387_v57  ;;  %1249 = vmatpush3.bf16.msra.mxu1 %v1398_v5 }
 0x112   :  { %1219 = vmatprep.subr.bf16.mxu0 %v1388_v58  ;;  %1250 = vmatprep.subr.bf16.mxu1 %v1468_v1 }
 0x115   :  { %1220 = vmatpush3.bf16.msra.mxu0 %v1389_v59  ;;  %1251 = vmatpush3.bf16.msra.mxu1 %v1399_v28 }
 0x116   :  { %1221 = vmatprep.subr.bf16.mxu0 %v1390_v60  ;;  %1252 = vmatprep.subr.bf16.mxu1 %v1468_v1 }
 0x119   :  { %1222 = vmatpush3.bf16.msra.mxu0 %v1391_v61  ;;  %1253 = vmatpush3.bf16.msra.mxu1 %v1400_v29 }
 0x11a   :  { %1223 = vmatprep.subr.bf16.mxu0 %v1392_v62  ;;  %1254 = vmatprep.subr.bf16.mxu1 %v1468_v1 }
 0x11d   :  { %1224 = vmatpush3.bf16.msra.mxu0 %v1393_v63  ;;  %1255 = vmatpush3.bf16.msra.mxu1 %v1401_v30 }
 0x1c0   :  { %v698_v9 = vpop.f32.mrf.mxu0  ;;  %v739_v10 = vpop.f32.mrf.mxu1 }
 0x1c1   :  { %v699_v11 = vadd.f32 %v698_v9, %v337_v7 }
 0x1c2   :  { %v700_v12 = vpop.f32.mrf.mxu0  ;;  %v741_v13 = vpop.f32.mrf.mxu1 }
 0x1c3   :  { %v740_v16 = vadd.f32 %v739_v10, %v699_v11  ;;  %v701_v17 = vadd.f32 %v700_v12, %v341_v8 }
 0x1c4   :  { %v702_v19 = vpop.f32.mrf.mxu0  ;;  %v743_v20 = vpop.f32.mrf.mxu1 }
 0x1c5   :  { %v746_v21 = vpack.c.bf16 %v740_v16, %v740_v16  ;;  %v742_v23 = vadd.f32 %v741_v13, %v701_v17 }
 0x1c6   :  { %v703_v24 = vpop.f32.mrf.mxu0  ;;  %v744_v25 = vpop.f32.mrf.mxu1 }
 0x1c7   :  { %v747_v15 = vpack.c.bf16 %v742_v23, %v742_v23  ;;  %v764_v26 = vmul.bf16 %v762_v22, %v746_v21  ;;  %vm748_vm5 = vcmp.ge.bf16.partialorder %v746_v21, 0 }
 0x1c9   :  { %v765_v14 = vmul.bf16 %v762_v22, %v747_v15  ;;  %vm749_vm6 = vcmp.ge.bf16.partialorder %v747_v15, 0  ;;  %v766_v27 = vsel %vm748_vm5, %v746_v21, %v764_v26 }
 0x1cb   :  { %v767_v18 = vsel %vm749_vm6, %v747_v15, %v765_v14 }
 0x1cc   :  { %935 = vmatprep.mubr.bf16.mxu0 %v767_v18 }
 0x1cd   :  { %936 = vmatmul.mubr.bf16.vlgmr.msra.gmra.mxu0 %v766_v27 }
 0x28d   :  { %v1225_v31 = vpop.f32.mrf.mxu0 }
 0x28f   :  { %v1226_v33 = vpop.f32.mrf.mxu0 }
 0x290   :  { %v1227_v34 = vadd.f32 %v1226_v33, %v1225_v31 }
 0x291   :  { %v1228_v35 = vpop.f32.mrf.mxu0 }
 0x292   :  { %v938_v36 = vadd.f32 %v1227_v34, %v1181_v32 }
 0x293   :  { %v1229_v38 = vpop.f32.mrf.mxu0 }
 0x294   :  { %v943_v39 = vpack.c.bf16 %v938_v36, %v938_v36 }
 0x296   :  { %v959_v40 = vmul.bf16 %v957_v37, %v943_v39  ;;  %vm944_vm8 = vcmp.ge.bf16.partialorder %v943_v39, 0 }
 0x298   :  { %v960_v41 = vsel %vm944_vm8, %v943_v39, %v959_v40 }
 0x299   :  { %1257 = vmatmul.mubr.bf16.vlgmr.msra.gmra.mxu1 %v960_v41 }
 0x359   :  { %v1066_v43 = vpop.f32.mrf.mxu1 }
 0x35a   :  { %v1067_v45 = vadd.f32 %v1198_v42, %v1066_v43 }
 0x35b   :  { %v1258_v46 = vpop.f32.mrf.mxu1 }
 0x35c   :  { %v1074_v47 = vmul.f32 %v1073_v44, %v1067_v45  ;;  %vm1072_vm9 = vcmp.ge.f32.partialorder %v1067_v45, 0.0 }
 0x35d   :  { %v1069_v49 = vpop.f32.mrf.mxu1 }
 0x35e   :  { %v1075_v50 = vsel %vm1072_vm9, %v1067_v45, %v1074_v47 }
 0x35f   :  { %v1259_v51 = vpop.f32.mrf.mxu1  ;;  %v1083_v52 = vmul.f32 %v1207_v48, %v1075_v50 }
 0x361   :  { %v1085_v53 = vsel %vm1084_vm10, %v1083_v52, 0.0 }
 0x362   :  { %1086 = vadd.xlane.f32.xlu0 %v1085_v53 }
 0x3eb   :  { %v1087_v55 = vpop.xlane.xlu0 %1086 }
 0x3ec   :  { %v1095_v56 = vadd.f32 %v1208_v54, %v1087_v55 }
 0x3ee   :  { %1097 = vst.msk [vmem:[%s1641_s12] sm:$0xff] %vm1096_vm11, %v1095_v56 }
 0x3ef   :  { %1102 = vsyncpa [#allocation6], 1 }
 0x3f0   :  { %1103 = vsyncpa [#allocation8], 1 }

// kernel: tpu_custom_call.1
= control target key start
LH: loop header
LB: loop body
LE: loop exit
PB: predicated region body
PF: predicated region fallthrough
CT: control target
= control target key end

     0   :  { %s1630_s0 = inlined_call_operand.vmem [shape: f32[4], index: 0, kind: input, shape index: {}]   ;;  %s1631_s1 = inlined_call_operand.vmem [shape: f32[8,32], index: 1, kind: input, shape index: {}]   ;;  %s1632_s2 = inlined_call_operand.vmem [shape: bf16[32,512], index: 2, kind: input, shape index: {}]   ;;  %s1633_s3 = inlined_call_operand.vmem [shape: f32[1,512], index: 3, kind: input, shape index: {}]   ;;  %s1634_s4 = inlined_call_operand.hbm [shape: bf16[512,256], index: 4, kind: input, shape index: {}]   ;;  %s1635_s5 = inlined_call_operand.vmem [shape: f32[1,256], index: 5, kind: input, shape index: {}]   ;;  %s1636_s6 = inlined_call_operand.hbm [shape: bf16[256,128], index: 6, kind: input, shape index: {}]   ;;  %s1637_s7 = inlined_call_operand.vmem [shape: f32[1,128], index: 7, kind: input, shape index: {}]   ;;  %s1638_s8 = inlined_call_operand.vmem [shape: bf16[128,64], index: 8, kind: input, shape index: {}]   ;;  %s1639_s9 = inlined_call_operand.vmem [shape: f32[1,64], index: 9, kind: input, shape index: {}]   ;;  %s1640_s10 = inlined_call_operand.vmem [shape: f32[1,64], index: 10, kind: input, shape index: {}]   ;;  %s1641_s12 = inlined_call_operand.vmem [shape: f32[8,1], index: 12, kind: output, shape index: {}]   ;;  %s1642_s11 = inlined_call_operand.<no memory space> [shape: f32[1,1], index: 11, kind: input, shape index: {}]  }
   0x1   :  { %s17_s23 = sshll.u32 %s1630_s0, 4  ;;  %v21_v0 = vstv %s1642_s11  ;;  %s18_s23 = int_to_ptr.vmem [resolvable:$true] %s17_s23 }
   0x2   :  { %22 = vst [vmem:[#allocation4] sm:$0x1] %v21_v0  ;;  %s1402_s26 = scalar_lea.vmem %s18_s23, 16  ;;  %p1407_p1 = scmp.lt.s32.totalorder %s18_s23, %s18_s23 }
   0x3   :  { %p1403_p0 = scmp.ne.s32.totalorder %s18_s23, %s1402_s26  ;;  %p1408_p2 = scmp.lt.s32.totalorder %s1402_s26, %s1402_s26 }
   0x5   :  { %p1409_p3 = por %p1408_p2, %p1407_p1 }
   0x7   :  { %p1410_p4 = pnand %p1409_p3, %p1403_p0 }
   0x9   :  { %1413 = shalt.err (!%p1410_p4)  }
   0xa   :  { %s1460_s27 = smov [#allocation3]  }
   0xb   :  { %20 = dma.vmem_to_smem %s18_s23, 16, %s1460_s27, [#allocation2] }
   0xc   :  { %1454 = dma.done.wait [#allocation2], 16 }
   0xd   :  { %1455 = vsyncadd [#allocation2], 4294967280 }
   0xe   :  { %24 = sfence }
   0xf   :  { %25 = vsyncpa [#allocation6], 0 }
  0x10   :  { %26 = vsyncpa [#allocation8], 0  ;;  %s1461_s0 = smov [#allocation5]  }
  0x11   :  { %s38_s28 = sshll.u32 %s1461_s0, 4  ;;  %s39_s28 = int_to_ptr.vmem [resolvable:$true] %s38_s28 }
  0x12   :  { %s1422_s11 = scalar_lea.vmem %s39_s28, 8192  ;;  %p1427_p6 = scmp.lt.s32.totalorder %s39_s28, %s39_s28 }
  0x13   :  { %p1423_p5 = scmp.ne.s32.totalorder %s39_s28, %s1422_s11  ;;  %p1428_p7 = scmp.lt.s32.totalorder %s1422_s11, %s1422_s11 }
  0x15   :  { %p1429_p8 = por %p1428_p7, %p1427_p6 }
  0x17   :  { %p1430_p9 = pnand %p1429_p8, %p1423_p5 }
  0x19   :  { %1433 = shalt.err (!%p1430_p9)
}
  0x1a   :  { %s1462_s29 = smov 128   ;;  %s1463_s30 = smov 8  }
  0x1b   :  { %44 = dma.hbm_to_vmem [thread:$0]  %s1634_s4, 8192, %s39_s28, [#allocation6], %s1462_s29, %s1462_s29, %s1463_s30  }
  0x1c   :  { %s1464_s15 = smov [#allocation7]  }
  0x1d   :  { %s52_s16 = sshll.u32 %s1464_s15, 4  ;;  %s53_s16 = int_to_ptr.vmem [resolvable:$true] %s52_s16 }
  0x1e   :  { %s1442_s17 = scalar_lea.vmem %s53_s16, 2048  ;;  %p1447_p11 = scmp.lt.s32.totalorder %s53_s16, %s53_s16 }
  0x1f   :  { %p1443_p10 = scmp.ne.s32.totalorder %s53_s16, %s1442_s17  ;;  %p1448_p12 = scmp.lt.s32.totalorder %s1442_s17, %s1442_s17 }
  0x21   :  { %p1449_p13 = por %p1448_p12, %p1447_p11 }
  0x23   :  { %p1450_p0 = pnand %p1449_p13, %p1443_p10 }
  0x25   :  { %1453 = shalt.err (!%p1450_p0)
}
  0x26   :  { %s1465_s18 = smov 64   ;;  %s1466_s19 = smov 4  }
  0x27   :  { %58 = dma.hbm_to_vmem [thread:$0]  %s1636_s6, 2048, %s53_s16, [#allocation8], %s1465_s18, %s1465_s18, %s1466_s19  }
  0x28   :  { %1456 = dma.done.wait [#allocation6], 8192  }
  0x29   :  { %1457 = vsyncadd [#allocation6], 4294959104 }
  0x2a   :  { %1458 = dma.done.wait [#allocation8], 2048  }
  0x2b   :  { %1459 = vsyncadd [#allocation8], 4294965248  ;;  %v1467_v1 = vmov 0   ;;  %v1270_v2 = vld [vmem:[%s1632_s2 + $0x24] ss:$16 sps:$4 sm:$0xff]   ;;  %vm152_vm0 = vcmask 261120  }
  0x2c   :  { %188 = vmatprep.mubr.bf16.mxu0 %v1467_v1  ;;  %229 = vmatprep.mubr.bf16.mxu1 %v1467_v1  ;;  %v1272_v3 = vld [vmem:[%s1632_s2 + $0x2c] ss:$16 sps:$4 sm:$0xff]   ;;  %v1274_v4 = vld [vmem:[%s1632_s2 + $0x20] ss:$16 sps:$4 sm:$0xff]   ;;  %v1275_v5 = vld [vmem:[%s1632_s2 + $0x28] ss:$16 sps:$4 sm:$0xff]  }
  0x2d   :  { %168 = vmatprep.subr.bf16.mxu0 %v1270_v2  ;;  %209 = vmatprep.subr.bf16.mxu1 %v1272_v3  ;;  %v1276_v6 = vld [vmem:[%s1632_s2 + $0x4] ss:$16 sps:$4 sm:$0xff]   ;;  %v1278_v7 = vld [vmem:[%s1632_s2 + $0xc] ss:$16 sps:$4 sm:$0xff]   ;;  %v1280_v8 = vld [vmem:[%s1632_s2] ss:$16 sps:$4 sm:$0xff]  }
  0x2e   :  { %169 = vmatpush1.bf16.msra.mxu0 %v1274_v4  ;;  %210 = vmatpush1.bf16.msra.mxu1 %v1275_v5  ;;  %v1281_v9 = vld [vmem:[%s1632_s2 + $0x8] ss:$16 sps:$4 sm:$0xff]   ;;  %v80_v10 = vld [vmem:[%s1631_s1] sm:$0xff]  ;;  %s76_s1 = sld [smem:[#allocation3]]  ;;  %vm1469_vm7 = vmmov 0   ;;  %vm1084_vm10 = vcmask 523264  }
  0x2f   :  { %170 = vmatprep.subr.bf16.mxu0 %v1276_v6  ;;  %211 = vmatprep.subr.bf16.mxu1 %v1278_v7  ;;  %v1282_v11 = vld [vmem:[#allocation5 + $0x70] ss:$8 sps:$4 sm:$0xff]   ;;  %v1284_v12 = vld [vmem:[#allocation5 + $0x74] ss:$8 sps:$4 sm:$0xff]   ;;  %v81_v13 = vpack.c.bf16 %v80_v10, %v80_v10  ;;  %v1290_v16 = vld [vmem:[#allocation5 + $0x64] ss:$8 sps:$4 sm:$0xff]  }
  0x30   :  { %v1285_v14 = vld [vmem:[#allocation5 + $0x170] ss:$8 sps:$4 sm:$0xff]   ;;  %v1287_v15 = vld [vmem:[#allocation5 + $0x174] ss:$8 sps:$4 sm:$0xff]   ;;  %v1293_v17 = vld [vmem:[#allocation5 + $0x164] ss:$8 sps:$4 sm:$0xff]  }
  0x31   :  { %v1288_v18 = vld [vmem:[#allocation5 + $0x60] ss:$8 sps:$4 sm:$0xff]   ;;  %v1296_v20 = vld [vmem:[#allocation5 + $0x54] ss:$8 sps:$4 sm:$0xff]   ;;  %v1294_v22 = vld [vmem:[#allocation5 + $0x50] ss:$8 sps:$4 sm:$0xff]  }
  0x32   :  { %171 = vmatpush1.bf16.msra.mxu0 %v1280_v8  ;;  %212 = vmatpush1.bf16.msra.mxu1 %v1281_v9  ;;  %v1291_v19 = vld [vmem:[#allocation5 + $0x160] ss:$8 sps:$4 sm:$0xff]   ;;  %v1299_v21 = vld [vmem:[#allocation5 + $0x154] ss:$8 sps:$4 sm:$0xff]   ;;  %v1297_v23 = vld [vmem:[#allocation5 + $0x150] ss:$8 sps:$4 sm:$0xff]  }
  0x33   :  { %664 = vmatprep.subr.bf16.mxu0 %v1284_v12  ;;  %705 = vmatprep.subr.bf16.mxu1 %v1287_v15  ;;  %v1302_v24 = vld [vmem:[#allocation5 + $0x44] ss:$8 sps:$4 sm:$0xff]   ;;  %v1300_v26 = vld [vmem:[#allocation5 + $0x40] ss:$8 sps:$4 sm:$0xff]   ;;  %v1308_v28 = vld [vmem:[#allocation5 + $0x34] ss:$8 sps:$4 sm:$0xff]  }
  0x34   :  { %v1305_v25 = vld [vmem:[#allocation5 + $0x144] ss:$8 sps:$4 sm:$0xff]   ;;  %v1303_v27 = vld [vmem:[#allocation5 + $0x140] ss:$8 sps:$4 sm:$0xff]   ;;  %v1311_v29 = vld [vmem:[#allocation5 + $0x134] ss:$8 sps:$4 sm:$0xff]   ;;  %p247_p1 = scmp.ne.f32.partialorder %s76_s1, %s76_s1 }
  0x35   :  { %1115 = vmatmul.mubr.msk.bf16.vlgmr.msra.gmra.mxu0 %vm152_vm0, %v81_v13  ;;  %1116 = vmatmul.mubr.msk.bf16.vlgmr.msra.gmra.mxu1 %vm152_vm0, %v81_v13  ;;  %v1306_v30 = vld [vmem:[#allocation5 + $0x30] ss:$8 sps:$4 sm:$0xff]   ;;  %v1314_v32 = vld [vmem:[#allocation5 + $0x24] ss:$8 sps:$4 sm:$0xff]   ;;  %v1312_v34 = vld [vmem:[#allocation5 + $0x20] ss:$8 sps:$4 sm:$0xff]   ;;  %v92_v13 = vlaneseq }
  0x36   :  { %665 = vmatpush1.bf16.msra.mxu0 %v1282_v11  ;;  %706 = vmatpush1.bf16.msra.mxu1 %v1285_v14  ;;  %v1309_v31 = vld [vmem:[#allocation5 + $0x130] ss:$8 sps:$4 sm:$0xff]   ;;  %v1317_v33 = vld [vmem:[#allocation5 + $0x124] ss:$8 sps:$4 sm:$0xff]   ;;  %v1315_v35 = vld [vmem:[#allocation5 + $0x120] ss:$8 sps:$4 sm:$0xff]  }
  0x37   :  { %666 = vmatprep.subr.bf16.mxu0 %v1290_v16  ;;  %707 = vmatprep.subr.bf16.mxu1 %v1293_v17  ;;  %v1320_v36 = vld [vmem:[#allocation5 + $0x14] ss:$8 sps:$4 sm:$0xff]   ;;  %v1318_v38 = vld [vmem:[#allocation5 + $0x10] ss:$8 sps:$4 sm:$0xff]   ;;  %v1326_v40 = vld [vmem:[#allocation5 + $0x4] ss:$8 sps:$4 sm:$0xff]  }
  0x38   :  { %v1323_v37 = vld [vmem:[#allocation5 + $0x114] ss:$8 sps:$4 sm:$0xff]   ;;  %v1321_v39 = vld [vmem:[#allocation5 + $0x110] ss:$8 sps:$4 sm:$0xff]   ;;  %v1329_v41 = vld [vmem:[#allocation5 + $0x104] ss:$8 sps:$4 sm:$0xff]  }
  0x39   :  { %v1324_v42 = vld [vmem:[#allocation5] ss:$8 sps:$4 sm:$0xff]   ;;  %v1332_v44 = vld [vmem:[#allocation5 + $0xf4] ss:$8 sps:$4 sm:$0xff]   ;;  %v1330_v46 = vld [vmem:[#allocation5 + $0xf0] ss:$8 sps:$4 sm:$0xff]  }
  0x3a   :  { %667 = vmatpush1.bf16.msra.mxu0 %v1288_v18  ;;  %708 = vmatpush1.bf16.msra.mxu1 %v1291_v19  ;;  %v1327_v43 = vld [vmem:[#allocation5 + $0x100] ss:$8 sps:$4 sm:$0xff]   ;;  %v1335_v45 = vld [vmem:[#allocation5 + $0x1f4] ss:$8 sps:$4 sm:$0xff]   ;;  %v1333_v47 = vld [vmem:[#allocation5 + $0x1f0] ss:$8 sps:$4 sm:$0xff]  }
  0x3b   :  { %668 = vmatprep.subr.bf16.mxu0 %v1296_v20  ;;  %709 = vmatprep.subr.bf16.mxu1 %v1299_v21  ;;  %v1338_v48 = vld [vmem:[#allocation5 + $0xe4] ss:$8 sps:$4 sm:$0xff]   ;;  %v1336_v50 = vld [vmem:[#allocation5 + $0xe0] ss:$8 sps:$4 sm:$0xff]   ;;  %v1344_v52 = vld [vmem:[#allocation5 + $0xd4] ss:$8 sps:$4 sm:$0xff]  }
  0x3c   :  { %v1341_v49 = vld [vmem:[#allocation5 + $0x1e4] ss:$8 sps:$4 sm:$0xff]   ;;  %v1339_v51 = vld [vmem:[#allocation5 + $0x1e0] ss:$8 sps:$4 sm:$0xff]   ;;  %v1347_v53 = vld [vmem:[#allocation5 + $0x1d4] ss:$8 sps:$4 sm:$0xff]  }
  0x3d   :  { %v1342_v54 = vld [vmem:[#allocation5 + $0xd0] ss:$8 sps:$4 sm:$0xff]   ;;  %v1350_v56 = vld [vmem:[#allocation5 + $0xc4] ss:$8 sps:$4 sm:$0xff]   ;;  %v1348_v58 = vld [vmem:[#allocation5 + $0xc0] ss:$8 sps:$4 sm:$0xff]  }
  0x3e   :  { %669 = vmatpush1.bf16.msra.mxu0 %v1294_v22  ;;  %710 = vmatpush1.bf16.msra.mxu1 %v1297_v23  ;;  %v1345_v55 = vld [vmem:[#allocation5 + $0x1d0] ss:$8 sps:$4 sm:$0xff]   ;;  %v1353_v57 = vld [vmem:[#allocation5 + $0x1c4] ss:$8 sps:$4 sm:$0xff]   ;;  %v1351_v59 = vld [vmem:[#allocation5 + $0x1c0] ss:$8 sps:$4 sm:$0xff]  }
  0x3f   :  { %670 = vmatprep.subr.bf16.mxu0 %v1302_v24  ;;  %711 = vmatprep.subr.bf16.mxu1 %v1305_v25  ;;  %v1356_v60 = vld [vmem:[#allocation5 + $0xb4] ss:$8 sps:$4 sm:$0xff]   ;;  %v1354_v62 = vld [vmem:[#allocation5 + $0xb0] ss:$8 sps:$4 sm:$0xff]   ;;  %v1362_v0 = vld [vmem:[#allocation5 + $0xa4] ss:$8 sps:$4 sm:$0xff]  }
  0x40   :  { %v1359_v61 = vld [vmem:[#allocation5 + $0x1b4] ss:$8 sps:$4 sm:$0xff]   ;;  %v1357_v63 = vld [vmem:[#allocation5 + $0x1b0] ss:$8 sps:$4 sm:$0xff]   ;;  %v1365_v1 = vld [vmem:[#allocation5 + $0x1a4] ss:$8 sps:$4 sm:$0xff]  }
  0x41   :  { %v1360_v2 = vld [vmem:[#allocation5 + $0xa0] ss:$8 sps:$4 sm:$0xff]   ;;  %v1368_v4 = vld [vmem:[#allocation5 + $0x94] ss:$8 sps:$4 sm:$0xff]   ;;  %v1366_v6 = vld [vmem:[#allocation5 + $0x90] ss:$8 sps:$4 sm:$0xff]  }
  0x42   :  { %671 = vmatpush1.bf16.msra.mxu0 %v1300_v26  ;;  %712 = vmatpush1.bf16.msra.mxu1 %v1303_v27  ;;  %v1363_v3 = vld [vmem:[#allocation5 + $0x1a0] ss:$8 sps:$4 sm:$0xff]   ;;  %v1371_v5 = vld [vmem:[#allocation5 + $0x194] ss:$8 sps:$4 sm:$0xff]   ;;  %v1369_v7 = vld [vmem:[#allocation5 + $0x190] ss:$8 sps:$4 sm:$0xff]  }
  0x43   :  { %672 = vmatprep.subr.bf16.mxu0 %v1308_v28  ;;  %713 = vmatprep.subr.bf16.mxu1 %v1311_v29  ;;  %v1374_v8 = vld [vmem:[#allocation5 + $0x84] ss:$8 sps:$4 sm:$0xff]   ;;  %v1372_v10 = vld [vmem:[#allocation5 + $0x80] ss:$8 sps:$4 sm:$0xff]   ;;  %v1378_v12 = vld [vmem:[#allocation7 + $0x78] sm:$0xff]   ;;  %s248_s2 = sshrl.u32 %s76_s1, 16 }
  0x44   :  { %v1377_v9 = vld [vmem:[#allocation5 + $0x184] ss:$8 sps:$4 sm:$0xff]   ;;  %v1375_v11 = vld [vmem:[#allocation5 + $0x180] ss:$8 sps:$4 sm:$0xff]   ;;  %s249_s18 = sand.u32 1, %s248_s2  ;;  %v1574_v14 = vshrl.u32 %v92_v13, 7 }
  0x45   :  { %s250_s19 = sadd.s32 32767, %s249_s18  ;;  %v90_v17 = vld [vmem:[%s1633_s3] sm:$0xf]  ;;  %s1104_s14 = sld [smem:[#allocation3 + $0x1]]  ;;  %vm1096_vm11 = vcmask 7168  }
  0x46   :  { %673 = vmatpush1.bf16.msra.mxu0 %v1306_v30  ;;  %714 = vmatpush1.bf16.msra.mxu1 %v1309_v31  ;;  %s251_s20 = sadd.s32 %s250_s19, %s76_s1  ;;  %v94_v15 = vsub.s32 0, %v1574_v14  ;;  %v102_v16 = vsub.s32 2, %v1574_v14  ;;  %v98_v18 = vsub.s32 1, %v1574_v14  ;;  %v106_v19 = vsub.s32 3, %v1574_v14  ;;  %s1105_s26 = sld [smem:[#allocation3 + $0x2]] }
  0x47   :  { %674 = vmatprep.subr.bf16.mxu0 %v1314_v32  ;;  %715 = vmatprep.subr.bf16.mxu1 %v1317_v33  ;;  %s252_s21 = sand.u32 4294901760, %s251_s20 }
  0x48   :  { %s1644_s21 = smov (%p247_p1, %s252_s21), 2143289344  ;;  %v95_v20 = vrot.slane %v90_v17, %v94_v15  ;;  %v103_v21 = vrot.slane %v90_v17, %v102_v16  ;;  %v99_v22 = vrot.slane %v90_v17, %v98_v18  ;;  %v107_v23 = vrot.slane %v90_v17, %v106_v19 }
  0x49   :  { %s255_s23 = sshrl.u32 %s1644_s21, 16 }
  0x4a   :  { %675 = vmatpush1.bf16.msra.mxu0 %v1312_v34  ;;  %716 = vmatpush1.bf16.msra.mxu1 %v1315_v35  ;;  %s256_s24 = sshll.u32 %s255_s23, 16 }
  0x4b   :  { %676 = vmatprep.subr.bf16.mxu0 %v1320_v36  ;;  %717 = vmatprep.subr.bf16.mxu1 %v1323_v37  ;;  %s257_s25 = sor.u32 %s256_s24, %s255_s23  ;;  %s752_s15 = sshrl.u32 %s1104_s14, 16 }
  0x4c   :  { %v258_v34 = vstv %s257_s25  ;;  %s753_s16 = sand.u32 1, %s752_s15  ;;  %p751_p2 = scmp.ne.f32.partialorder %s1104_s14, %s1104_s14 }
  0x4d   :  { %s754_s17 = sadd.s32 32767, %s753_s16  ;;  %s947_s6 = sshrl.u32 %s1105_s26, 16 }
  0x4e   :  { %677 = vmatpush1.bf16.msra.mxu0 %v1318_v38  ;;  %718 = vmatpush1.bf16.msra.mxu1 %v1321_v39  ;;  %s755_s1 = sadd.s32 %s1104_s14, %s754_s17  ;;  %s948_s27 = sand.u32 1, %s947_s6 }
  0x4f   :  { %678 = vmatprep.subr.bf16.mxu0 %v1326_v40  ;;  %719 = vmatprep.subr.bf16.mxu1 %v1329_v41  ;;  %s756_s2 = sand.u32 4294901760, %s755_s1  ;;  %s949_s0 = sadd.s32 32767, %s948_s27 }
  0x50   :  { %s1646_s2 = smov (%p751_p2, %s756_s2), 2143289344  ;;  %s950_s28 = sadd.s32 %s1105_s26, %s949_s0 }
  0x51   :  { %s759_s20 = sshrl.u32 %s1646_s2, 16  ;;  %p946_p3 = scmp.ne.f32.partialorder %s1105_s26, %s1105_s26 }
  0x52   :  { %679 = vmatpush1.bf16.msra.mxu0 %v1324_v42  ;;  %720 = vmatpush1.bf16.msra.mxu1 %v1327_v43  ;;  %s760_s21 = sshll.u32 %s759_s20, 16  ;;  %s951_s11 = sand.u32 4294901760, %s950_s28 }
  0x53   :  { %680 = vmatprep.subr.bf16.mxu0 %v1332_v44  ;;  %721 = vmatprep.subr.bf16.mxu1 %v1335_v45  ;;  %v1379_v45 = vld [vmem:[#allocation7 + $0x38] sm:$0xff]   ;;  %s761_s4 = sor.u32 %s760_s21, %s759_s20  ;;  %s1648_s11 = smov (%p946_p3, %s951_s11), 2143289344 }
  0x54   :  { %s954_s29 = sshrl.u32 %s1648_s11, 16  ;;  %s1106_s15 = sld [smem:[#allocation3 + $0x3]] }
  0x55   :  { %s955_s30 = sshll.u32 %s954_s29, 16 }
  0x56   :  { %681 = vmatpush2.bf16.msra.mxu0 %v1330_v46  ;;  %722 = vmatpush2.bf16.msra.mxu1 %v1333_v47 }
  0x57   :  { %682 = vmatprep.subr.bf16.mxu0 %v1338_v48  ;;  %723 = vmatprep.subr.bf16.mxu1 %v1341_v49  ;;  %v1380_v48 = vld [vmem:[#allocation7 + $0x70] sm:$0xff]  }
  0x5a   :  { %683 = vmatpush2.bf16.msra.mxu0 %v1336_v50  ;;  %724 = vmatpush2.bf16.msra.mxu1 %v1339_v51  ;;  %v1381_v51 = vld [vmem:[#allocation7 + $0x30] sm:$0xff]  }
  0x5b   :  { %684 = vmatprep.subr.bf16.mxu0 %v1344_v52  ;;  %725 = vmatprep.subr.bf16.mxu1 %v1347_v53  ;;  %v1382_v52 = vld [vmem:[#allocation7 + $0x68] sm:$0xff]  }
  0x5c   :  { %v1383_v53 = vld [vmem:[#allocation7 + $0x28] sm:$0xff]  }
  0x5e   :  { %685 = vmatpush2.bf16.msra.mxu0 %v1342_v54  ;;  %726 = vmatpush2.bf16.msra.mxu1 %v1345_v55  ;;  %v1384_v54 = vld [vmem:[#allocation7 + $0x60] sm:$0xff]  }
  0x5f   :  { %686 = vmatprep.subr.bf16.mxu0 %v1350_v56  ;;  %727 = vmatprep.subr.bf16.mxu1 %v1353_v57  ;;  %v1385_v55 = vld [vmem:[#allocation7 + $0x20] sm:$0xff]   ;;  %v1386_v56 = vld [vmem:[#allocation7 + $0x58] sm:$0xff]  }
  0x60   :  { %v1387_v57 = vld [vmem:[#allocation7 + $0x18] sm:$0xff]  }
  0x62   :  { %687 = vmatpush2.bf16.msra.mxu0 %v1348_v58  ;;  %728 = vmatpush2.bf16.msra.mxu1 %v1351_v59  ;;  %v1388_v58 = vld [vmem:[#allocation7 + $0x50] sm:$0xff]  }
  0x63   :  { %688 = vmatprep.subr.bf16.mxu0 %v1356_v60  ;;  %729 = vmatprep.subr.bf16.mxu1 %v1359_v61  ;;  %v1389_v59 = vld [vmem:[#allocation7 + $0x10] sm:$0xff]   ;;  %v1390_v60 = vld [vmem:[#allocation7 + $0x48] sm:$0xff]  }
  0x64   :  { %v1391_v61 = vld [vmem:[#allocation7 + $0x8] sm:$0xff]  }
  0x66   :  { %689 = vmatpush2.bf16.msra.mxu0 %v1354_v62  ;;  %730 = vmatpush2.bf16.msra.mxu1 %v1357_v63  ;;  %v1392_v62 = vld [vmem:[#allocation7 + $0x40] sm:$0xff]  }
  0x67   :  { %690 = vmatprep.subr.bf16.mxu0 %v1362_v0  ;;  %731 = vmatprep.subr.bf16.mxu1 %v1365_v1  ;;  %v1393_v63 = vld [vmem:[#allocation7] sm:$0xff]   ;;  %v1394_v0 = vld [vmem:[%s1638_s8 + $0x38] sm:$0xff]   ;;  %v1468_v1 = vmov 0.0  }
  0x6a   :  { %691 = vmatpush2.bf16.msra.mxu0 %v1360_v2  ;;  %732 = vmatpush2.bf16.msra.mxu1 %v1363_v3  ;;  %v1395_v2 = vld [vmem:[%s1638_s8 + $0x30] sm:$0xff]   ;;  %v1396_v3 = vld [vmem:[%s1638_s8 + $0x28] sm:$0xff]  }
  0x6b   :  { %692 = vmatprep.subr.bf16.mxu0 %v1368_v4  ;;  %733 = vmatprep.subr.bf16.mxu1 %v1371_v5  ;;  %v1397_v4 = vld [vmem:[%s1638_s8 + $0x20] sm:$0xff]   ;;  %v1398_v5 = vld [vmem:[%s1638_s8 + $0x18] sm:$0xff]  }
  0x6e   :  { %693 = vmatpush2.bf16.msra.mxu0 %v1366_v6  ;;  %734 = vmatpush2.bf16.msra.mxu1 %v1369_v7  ;;  %v332_v6 = vld [vmem:[%s1635_s5] sm:$0x3] }
  0x6f   :  { %694 = vmatprep.subr.bf16.mxu0 %v1374_v8  ;;  %735 = vmatprep.subr.bf16.mxu1 %v1377_v9  ;;  %v337_v7 = vrot.slane %v332_v6, %v94_v15  ;;  %v341_v8 = vrot.slane %v332_v6, %v98_v18 }
  0x72   :  { %695 = vmatpush2.bf16.msra.mxu0 %v1372_v10  ;;  %736 = vmatpush2.bf16.msra.mxu1 %v1375_v11 }
  0x73   :  { %1209 = vmatprep.subr.bf16.mxu0 %v1378_v12  ;;  %1240 = vmatprep.subr.bf16.mxu1 %v1468_v1 }
  0xf5   :  { %v190_v24 = vpop.f32.mrf.mxu0  ;;  %v231_v25 = vpop.f32.mrf.mxu1 }
  0xf6   :  { %v191_v26 = vadd.f32 %v190_v24, %v95_v20  ;;  %v232_v27 = vadd.f32 %v231_v25, %v103_v21 }
  0xf7   :  { %v192_v28 = vpop.f32.mrf.mxu0  ;;  %v233_v29 = vpop.f32.mrf.mxu1 }
  0xf8   :  { %v238_v30 = vpack.c.bf16 %v191_v26, %v191_v26  ;;  %v240_v31 = vpack.c.bf16 %v232_v27, %v232_v27  ;;  %v193_v32 = vadd.f32 %v192_v28, %v99_v22  ;;  %v234_v33 = vadd.f32 %v233_v29, %v107_v23  ;;  %v1399_v28 = vld [vmem:[%s1638_s8 + $0x10] sm:$0xff]   ;;  %v1400_v29 = vld [vmem:[%s1638_s8 + $0x8] sm:$0xff]  }
  0xf9   :  { %v194_v35 = vpop.f32.mrf.mxu0  ;;  %v235_v36 = vpop.f32.mrf.mxu1  ;;  %v762_v22 = vstv %s761_s4 }
  0xfa   :  { %v239_v37 = vpack.c.bf16 %v193_v32, %v193_v32  ;;  %v241_v38 = vpack.c.bf16 %v234_v33, %v234_v33  ;;  %vm242_vm1 = vcmp.ge.bf16.partialorder %v238_v30, 0  ;;  %v260_v41 = vmul.bf16 %v258_v34, %v238_v30  ;;  %v1181_v32 = vld [vmem:[%s1637_s7] ss:$0 sm:$0xff] }
  0xfb   :  { %v195_v39 = vpop.f32.mrf.mxu0  ;;  %v236_v40 = vpop.f32.mrf.mxu1  ;;  %vm244_vm2 = vcmp.ge.bf16.partialorder %v240_v31, 0  ;;  %v262_v42 = vmul.bf16 %v258_v34, %v240_v31 }
  0xfc   :  { %v261_v43 = vmul.bf16 %v258_v34, %v239_v37  ;;  %v263_v44 = vmul.bf16 %v258_v34, %v241_v38  ;;  %vm243_vm3 = vcmp.ge.bf16.partialorder %v239_v37, 0  ;;  %vm245_vm4 = vcmp.ge.bf16.partialorder %v241_v38, 0 }
  0xfd   :  { %v264_v49 = vsel %vm242_vm1, %v238_v30, %v260_v41  ;;  %v266_v50 = vsel %vm244_vm2, %v240_v31, %v262_v42  ;;  %v1401_v30 = vld [vmem:[%s1638_s8] sm:$0xff]   ;;  %s956_s8 = sor.u32 %s955_s30, %s954_s29 }
  0xfe   :  { %v265_v46 = vsel %vm243_vm3, %v239_v37, %v261_v43  ;;  %v267_v47 = vsel %vm245_vm4, %v241_v38, %v263_v44  ;;  %v957_v37 = vstv %s956_s8  ;;  %v1198_v42 = vld [vmem:[%s1639_s9] ss:$0 sm:$0xff]  ;;  %v1073_v44 = vstv %s1106_s15 }
  0xff   :  { %696 = vmatprep.mubr.bf16.mxu0 %v265_v46  ;;  %737 = vmatprep.mubr.bf16.mxu1 %v267_v47 }
 0x100   :  { %697 = vmatmul.mubr.bf16.vlgmr.msra.gmra.mxu0 %v264_v49  ;;  %738 = vmatmul.mubr.bf16.vlgmr.msra.gmra.mxu1 %v266_v50 }
 0x101   :  { %1210 = vmatpush3.bf16.msra.mxu0 %v1379_v45  ;;  %1241 = vmatpush3.bf16.msra.mxu1 %v1394_v0 }
 0x102   :  { %1211 = vmatprep.subr.bf16.mxu0 %v1380_v48  ;;  %1242 = vmatprep.subr.bf16.mxu1 %v1468_v1  ;;  %v1207_v48 = vld [vmem:[%s1640_s10] ss:$0 sm:$0xff] }
 0x103   :  { %1256 = vmatprep.mubr.msk.bf16.mxu1 %vm1469_vm7, %v1468_v1 }
 0x105   :  { %1212 = vmatpush3.bf16.msra.mxu0 %v1381_v51  ;;  %1243 = vmatpush3.bf16.msra.mxu1 %v1395_v2 }
 0x106   :  { %1213 = vmatprep.subr.bf16.mxu0 %v1382_v52  ;;  %1244 = vmatprep.subr.bf16.mxu1 %v1468_v1 }
 0x109   :  { %1214 = vmatpush3.bf16.msra.mxu0 %v1383_v53  ;;  %1245 = vmatpush3.bf16.msra.mxu1 %v1396_v3 }
 0x10a   :  { %1215 = vmatprep.subr.bf16.mxu0 %v1384_v54  ;;  %1246 = vmatprep.subr.bf16.mxu1 %v1468_v1  ;;  %v1208_v54 = vld [vmem:[#allocation4] ss:$0 sm:$0xff] }
 0x10d   :  { %1216 = vmatpush3.bf16.msra.mxu0 %v1385_v55  ;;  %1247 = vmatpush3.bf16.msra.mxu1 %v1397_v4 }
 0x10e   :  { %1217 = vmatprep.subr.bf16.mxu0 %v1386_v56  ;;  %1248 = vmatprep.subr.bf16.mxu1 %v1468_v1 }
 0x111   :  { %1218 = vmatpush3.bf16.msra.mxu0 %v1387_v57  ;;  %1249 = vmatpush3.bf16.msra.mxu1 %v1398_v5 }
 0x112   :  { %1219 = vmatprep.subr.bf16.mxu0 %v1388_v58  ;;  %1250 = vmatprep.subr.bf16.mxu1 %v1468_v1 }
 0x115   :  { %1220 = vmatpush3.bf16.msra.mxu0 %v1389_v59  ;;  %1251 = vmatpush3.bf16.msra.mxu1 %v1399_v28 }
 0x116   :  { %1221 = vmatprep.subr.bf16.mxu0 %v1390_v60  ;;  %1252 = vmatprep.subr.bf16.mxu1 %v1468_v1 }
 0x119   :  { %1222 = vmatpush3.bf16.msra.mxu0 %v1391_v61  ;;  %1253 = vmatpush3.bf16.msra.mxu1 %v1400_v29 }
 0x11a   :  { %1223 = vmatprep.subr.bf16.mxu0 %v1392_v62  ;;  %1254 = vmatprep.subr.bf16.mxu1 %v1468_v1 }
 0x11d   :  { %1224 = vmatpush3.bf16.msra.mxu0 %v1393_v63  ;;  %1255 = vmatpush3.bf16.msra.mxu1 %v1401_v30 }
 0x1c0   :  { %v698_v9 = vpop.f32.mrf.mxu0  ;;  %v739_v10 = vpop.f32.mrf.mxu1 }
 0x1c1   :  { %v699_v11 = vadd.f32 %v698_v9, %v337_v7 }
 0x1c2   :  { %v700_v12 = vpop.f32.mrf.mxu0  ;;  %v741_v13 = vpop.f32.mrf.mxu1 }
 0x1c3   :  { %v740_v16 = vadd.f32 %v739_v10, %v699_v11  ;;  %v701_v17 = vadd.f32 %v700_v12, %v341_v8 }
 0x1c4   :  { %v702_v19 = vpop.f32.mrf.mxu0  ;;  %v743_v20 = vpop.f32.mrf.mxu1 }
 0x1c5   :  { %v746_v21 = vpack.c.bf16 %v740_v16, %v740_v16  ;;  %v742_v23 = vadd.f32 %v741_v13, %v701_v17 }
 0x1c6   :  { %v703_v24 = vpop.f32.mrf.mxu0  ;;  %v744_v25 = vpop.f32.mrf.mxu1 }
 0x1c7   :  { %v747_v15 = vpack.c.bf16 %v742_v23, %v742_v23  ;;  %v764_v26 = vmul.bf16 %v762_v22, %v746_v21  ;;  %vm748_vm5 = vcmp.ge.bf16.partialorder %v746_v21, 0 }
 0x1c9   :  { %v765_v14 = vmul.bf16 %v762_v22, %v747_v15  ;;  %vm749_vm6 = vcmp.ge.bf16.partialorder %v747_v15, 0  ;;  %v766_v27 = vsel %vm748_vm5, %v746_v21, %v764_v26 }
 0x1cb   :  { %v767_v18 = vsel %vm749_vm6, %v747_v15, %v765_v14 }
 0x1cc   :  { %935 = vmatprep.mubr.bf16.mxu0 %v767_v18 }
 0x1cd   :  { %936 = vmatmul.mubr.bf16.vlgmr.msra.gmra.mxu0 %v766_v27 }
 0x28d   :  { %v1225_v31 = vpop.f32.mrf.mxu0 }
 0x28f   :  { %v1226_v33 = vpop.f32.mrf.mxu0 }
 0x290   :  { %v1227_v34 = vadd.f32 %v1226_v33, %v1225_v31 }
 0x291   :  { %v1228_v35 = vpop.f32.mrf.mxu0 }
 0x292   :  { %v938_v36 = vadd.f32 %v1227_v34, %v1181_v32 }
 0x293   :  { %v1229_v38 = vpop.f32.mrf.mxu0 }
 0x294   :  { %v943_v39 = vpack.c.bf16 %v938_v36, %v938_v36 }
 0x296   :  { %v959_v40 = vmul.bf16 %v957_v37, %v943_v39  ;;  %vm944_vm8 = vcmp.ge.bf16.partialorder %v943_v39, 0 }
 0x298   :  { %v960_v41 = vsel %vm944_vm8, %v943_v39, %v959_v40 }
 0x299   :  { %1257 = vmatmul.mubr.bf16.vlgmr.msra.gmra.mxu1 %v960_v41 }
 0x359   :  { %v1066_v43 = vpop.f32.mrf.mxu1 }
 0x35a   :  { %v1067_v45 = vadd.f32 %v1198_v42, %v1066_v43 }
 0x35b   :  { %v1258_v46 = vpop.f32.mrf.mxu1 }
 0x35c   :  { %v1074_v47 = vmul.f32 %v1073_v44, %v1067_v45  ;;  %vm1072_vm9 = vcmp.ge.f32.partialorder %v1067_v45, 0.0 }
 0x35d   :  { %v1069_v49 = vpop.f32.mrf.mxu1 }
 0x35e   :  { %v1075_v50 = vsel %vm1072_vm9, %v1067_v45, %v1074_v47 }
 0x35f   :  { %v1259_v51 = vpop.f32.mrf.mxu1  ;;  %v1083_v52 = vmul.f32 %v1207_v48, %v1075_v50 }
 0x361   :  { %v1085_v53 = vsel %vm1084_vm10, %v1083_v52, 0.0 }
 0x362   :  { %1086 = vadd.xlane.f32.xlu0 %v1085_v53 }
 0x3eb   :  { %v1087_v55 = vpop.xlane.xlu0 %1086 }
 0x3ec   :  { %v1095_v56 = vadd.f32 %v1208_v54, %v1087_v55 }
 0x3ee   :  { %1097 = vst.msk [vmem:[%s1641_s12] sm:$0xff] %vm1096_vm11, %v1095_v56 }
 0x3ef   :  { %1102 = vsyncpa [#allocation6], 1 }
 0x3f0   :  { %1103 = vsyncpa [#allocation8], 1 }

</bundles_post_ra>
